<compile_context>
chip_gen: v6e
topology: v6e:2x2x1
jax: 0.10.0
libtpu: 0.0.40
codegen_flags: <defaults>
</compile_context>

<pallas_src>
import functools

import jax
import jax.numpy as jnp
from jax import lax
from jax.experimental import pallas as pl
from jax.experimental.pallas import tpu as pltpu

# Keep kernel matmuls and the pure-JAX reference numerically consistent.
jax.config.update("jax_default_matmul_precision", "highest")

_EPS = 1e-5


def _round_up(a, b):
    return (a + b - 1) // b * b


# ---------------------------------------------------------------------------
# Fast path: one grid step per branch (whole branch resident in VMEM).
# ---------------------------------------------------------------------------
def _fast_kernel(x_ref, w1t_ref, g1_ref, b1_ref, w2t_ref, g2_ref, b2_ref,
                 y_ref, mid_ref, outer_ref, y1_buf,
                 *, n, count1, count2, n_ring1, eps):
    w1t = w1t_ref[0]                       # (C, C)  conv1 weight, transposed
    w2t = w2t_ref[0]                       # (P, C)  conv2 weight, transposed
    c = w1t.shape[0]

    # ---- stage 1: conv + batch stats (zero ring handled via count1) -------
    sum1 = jnp.zeros((c, 1), jnp.float32)
    sq1 = jnp.zeros((c, 1), jnp.float32)
    for i in range(n):                     # static unroll over the small batch
        y1 = jnp.dot(w1t, x_ref[0, i], preferred_element_type=jnp.float32)
        y1_buf[i] = y1
        sum1 = sum1 + jnp.sum(y1, axis=1, keepdims=True)
        sq1 = sq1 + jnp.sum(y1 * y1, axis=1, keepdims=True)

    mean1 = sum1 * (1.0 / count1)
    var1 = jnp.maximum(sq1 * (1.0 / count1) - mean1 * mean1, 0.0)
    scale1 = lax.rsqrt(var1 + eps) * g1_ref[0]            # (C, 1)
    shift1 = b1_ref[0] - mean1 * scale1                   # (C, 1)
    border1 = jnp.maximum(shift1, 0.0)                    # stage-1 ring value
    # stage-2 conv of the constant stage-1 ring; lane-broadcast keeps the MXU
    # operand well shaped, only column 0 is used.
    ring2 = jnp.dot(w2t, jnp.broadcast_to(border1, (c, 128)),
                    preferred_element_type=jnp.float32)[:, 0:1]   # (P, 1)

    # ---- stage 2: BN1 + ReLU, conv2, batch stats ---------------------------
    sum2 = n_ring1 * ring2
    sq2 = n_ring1 * (ring2 * ring2)
    for i in range(n):
        z1 = jnp.maximum(y1_buf[i] * scale1 + shift1, 0.0)
        y2 = jnp.dot(w2t, z1, preferred_element_type=jnp.float32)
        y_ref[0, i] = y2                   # stash pre-BN y2 in the out block
        sum2 = sum2 + jnp.sum(y2, axis=1, keepdims=True)
        sq2 = sq2 + jnp.sum(y2 * y2, axis=1, keepdims=True)

    mean2 = sum2 * (1.0 / count2)
    var2 = jnp.maximum(sq2 * (1.0 / count2) - mean2 * mean2, 0.0)
    scale2 = lax.rsqrt(var2 + eps) * g2_ref[0]            # (P, 1)
    shift2 = b2_ref[0] - mean2 * scale2

    for i in range(n):
        y_ref[0, i] = jnp.maximum(y_ref[0, i] * scale2 + shift2, 0.0)
    mid_ref[0] = jnp.maximum(ring2 * scale2 + shift2, 0.0)    # middle ring
    outer_ref[0] = jnp.maximum(shift2, 0.0)                   # outer ring


def fused_contrast_fast(x3, w1t, g1, b1, w2t, g2, b2, *, n, h, w):
    nb, _, c, hw = x3.shape
    p_dim = w2t.shape[1]
    count1 = float(n * (h + 2) * (w + 2))
    count2 = float(n * (h + 4) * (w + 4))
    n_ring1 = float(n * ((h + 2) * (w + 2) - h * w))

    kernel = functools.partial(_fast_kernel, n=n, count1=count1,
                               count2=count2, n_ring1=n_ring1, eps=_EPS)
    flops = int(2 * nb * n * hw * c * (c + p_dim))
    bytes_acc = int(4 * nb * n * hw * (c + p_dim))

    return pl.pallas_call(
        kernel,
        out_shape=(jax.ShapeDtypeStruct((nb, n, p_dim, hw), jnp.float32),
                   jax.ShapeDtypeStruct((nb, p_dim, 1), jnp.float32),
                   jax.ShapeDtypeStruct((nb, p_dim, 1), jnp.float32)),
        grid=(nb,),
        in_specs=[
            pl.BlockSpec((1, n, c, hw), lambda b: (b, 0, 0, 0)),
            pl.BlockSpec((1, c, c), lambda b: (b, 0, 0)),
            pl.BlockSpec((1, c, 1), lambda b: (b, 0, 0)),
            pl.BlockSpec((1, c, 1), lambda b: (b, 0, 0)),
            pl.BlockSpec((1, p_dim, c), lambda b: (b, 0, 0)),
            pl.BlockSpec((1, p_dim, 1), lambda b: (b, 0, 0)),
            pl.BlockSpec((1, p_dim, 1), lambda b: (b, 0, 0)),
        ],
        out_specs=(
            pl.BlockSpec((1, n, p_dim, hw), lambda b: (b, 0, 0, 0)),
            pl.BlockSpec((1, p_dim, 1), lambda b: (b, 0, 0)),
            pl.BlockSpec((1, p_dim, 1), lambda b: (b, 0, 0)),
        ),
        scratch_shapes=[pltpu.VMEM((n, c, hw), jnp.float32)],   # y1 stash
        compiler_params=pltpu.CompilerParams(
            dimension_semantics=("parallel",),
            vmem_limit_bytes=48 * 1024 * 1024),
        cost_estimate=pl.CostEstimate(flops=flops, transcendentals=0,
                                      bytes_accessed=bytes_acc),
    )(x3, w1t, g1, b1, w2t, g2, b2)


# ---------------------------------------------------------------------------
# Tiled path: 3-pass (stats1 / stats2 / write) pipeline for large shapes.
# ---------------------------------------------------------------------------
def _tiled_kernel(x_ref, w1t_ref, g1_ref, b1_ref, w2t_ref, g2_ref, b2_ref,
                  y_ref, mid_ref, outer_ref,
                  sum1, sq1, sum2, sq2,
                  scale1_s, shift1_s, scale2_s, shift2_s, ring2_s,
                  *, tile_hw, hw_valid, mask_needed,
                  count1, count2, n_ring1, eps):
    p = pl.program_id(1)       # pass: 0 = stats1, 1 = stats2, 2 = write
    i = pl.program_id(2)       # sample
    m = pl.program_id(3)       # spatial (lane) tile
    first = (i == 0) & (m == 0)

    @pl.when((p == 0) & first)
    def _init():
        sum1[...] = jnp.zeros(sum1.shape, sum1.dtype)
        sq1[...] = jnp.zeros(sq1.shape, sq1.dtype)
        sum2[...] = jnp.zeros(sum2.shape, sum2.dtype)
        sq2[...] = jnp.zeros(sq2.shape, sq2.dtype)

    x = x_ref[0, 0]                                       # (C, tile_hw)
    y1 = jnp.dot(w1t_ref[0], x, preferred_element_type=jnp.float32)

    @pl.when(p == 0)
    def _stats1():
        # spatial zero-padding columns give y1 == 0 -> contribute nothing;
        # the conv's zero ring is accounted for via count1 only.
        sum1[...] += jnp.sum(y1, axis=1, keepdims=True)
        sq1[...] += jnp.sum(y1 * y1, axis=1, keepdims=True)

    @pl.when((p == 1) & first)
    def _finalize1():
        mean1 = sum1[...] * (1.0 / count1)
        var1 = jnp.maximum(sq1[...] * (1.0 / count1) - mean1 * mean1, 0.0)
        scale1 = lax.rsqrt(var1 + eps) * g1_ref[0]
        shift1 = b1_ref[0] - mean1 * scale1
        scale1_s[...] = scale1
        shift1_s[...] = shift1
        border1 = jnp.maximum(shift1, 0.0)
        c = border1.shape[0]
        ring2 = jnp.dot(w2t_ref[0], jnp.broadcast_to(border1, (c, 128)),
                        preferred_element_type=jnp.float32)[:, 0:1]
        ring2_s[...] = ring2
        # fold the stage-1 ring's stage-2 contribution into the sums once
        sum2[...] += n_ring1 * ring2
        sq2[...] += n_ring1 * (ring2 * ring2)

    @pl.when(p == 1)
    def _stats2():
        z1 = jnp.maximum(y1 * scale1_s[...] + shift1_s[...], 0.0)
        if mask_needed:   # static predicate: only when HW was lane-padded
            col = m * tile_hw + lax.broadcasted_iota(jnp.int32, (1, tile_hw), 1)
            z1 = jnp.where(col < hw_valid, z1, 0.0)
        y2 = jnp.dot(w2t_ref[0], z1, preferred_element_type=jnp.float32)
        sum2[...] += jnp.sum(y2, axis=1, keepdims=True)
        sq2[...] += jnp.sum(y2 * y2, axis=1, keepdims=True)

    @pl.when((p == 2) & first)
    def _finalize2():
        mean2 = sum2[...] * (1.0 / count2)
        var2 = jnp.maximum(sq2[...] * (1.0 / count2) - mean2 * mean2, 0.0)
        scale2 = lax.rsqrt(var2 + eps) * g2_ref[0]
        shift2 = b2_ref[0] - mean2 * scale2
        scale2_s[...] = scale2
        shift2_s[...] = shift2
        mid_ref[0] = jnp.maximum(ring2_s[...] * scale2 + shift2, 0.0)
        outer_ref[0] = jnp.maximum(shift2, 0.0)

    @pl.when(p == 2)
    def _write():
        z1 = jnp.maximum(y1 * scale1_s[...] + shift1_s[...], 0.0)
        y2 = jnp.dot(w2t_ref[0], z1, preferred_element_type=jnp.float32)
        y_ref[0, 0] = jnp.maximum(y2 * scale2_s[...] + shift2_s[...], 0.0)


def fused_contrast_tiled(x3, w1t, g1, b1, w2t, g2, b2, *, n, h, w,
                         tile_hw=None):
    nb, _, c, hw = x3.shape
    p_dim = w2t.shape[1]

    # choose a lane tile: full spatial extent, or a multiple of 128
    if tile_hw is None:
        budget = 8 * 1024 * 1024               # double-buffered x + y blocks
        tile_hw = budget // (2 * 4 * (c + p_dim))
        tile_hw = max(128, tile_hw // 128 * 128)
    if hw <= 128 or tile_hw >= hw:
        tile_hw = hw
        hw_pad = hw
    else:
        tile_hw = max(128, tile_hw // 128 * 128)
        hw_pad = _round_up(hw, tile_hw)
    if hw_pad != hw:
        x3 = jnp.pad(x3, ((0, 0), (0, 0), (0, 0), (0, hw_pad - hw)))
    n_m = hw_pad // tile_hw

    count1 = float(n * (h + 2) * (w + 2))
    count2 = float(n * (h + 4) * (w + 4))
    n_ring1 = float(n * ((h + 2) * (w + 2) - h * w))

    kernel = functools.partial(
        _tiled_kernel, tile_hw=tile_hw, hw_valid=hw,
        mask_needed=(hw_pad != hw), count1=count1, count2=count2,
        n_ring1=n_ring1, eps=_EPS)

    flops = int(2 * nb * n * hw_pad * c * (3 * c + 2 * p_dim))
    bytes_acc = int(4 * nb * n * hw_pad * (3 * c + p_dim))

    return pl.pallas_call(
        kernel,
        out_shape=(jax.ShapeDtypeStruct((nb, n, p_dim, hw_pad), jnp.float32),
                   jax.ShapeDtypeStruct((nb, p_dim, 1), jnp.float32),
                   jax.ShapeDtypeStruct((nb, p_dim, 1), jnp.float32)),
        grid=(nb, 3, n, n_m),
        in_specs=[
            pl.BlockSpec((1, 1, c, tile_hw), lambda b, p, i, m: (b, i, 0, m)),
            pl.BlockSpec((1, c, c), lambda b, p, i, m: (b, 0, 0)),
            pl.BlockSpec((1, c, 1), lambda b, p, i, m: (b, 0, 0)),
            pl.BlockSpec((1, c, 1), lambda b, p, i, m: (b, 0, 0)),
            pl.BlockSpec((1, p_dim, c), lambda b, p, i, m: (b, 0, 0)),
            pl.BlockSpec((1, p_dim, 1), lambda b, p, i, m: (b, 0, 0)),
            pl.BlockSpec((1, p_dim, 1), lambda b, p, i, m: (b, 0, 0)),
        ],
        out_specs=(
            # Only written in pass 2; the index collapses to block 0 during the
            # stats passes so no garbage write-back traffic is generated.
            pl.BlockSpec((1, 1, p_dim, tile_hw),
                         lambda b, p, i, m: (b, i * (p // 2), 0, m * (p // 2))),
            pl.BlockSpec((1, p_dim, 1), lambda b, p, i, m: (b, 0, 0)),
            pl.BlockSpec((1, p_dim, 1), lambda b, p, i, m: (b, 0, 0)),
        ),
        scratch_shapes=[pltpu.VMEM((c, 1), jnp.float32),       # sum1
                        pltpu.VMEM((c, 1), jnp.float32),       # sumsq1
                        pltpu.VMEM((p_dim, 1), jnp.float32),   # sum2
                        pltpu.VMEM((p_dim, 1), jnp.float32),   # sumsq2
                        pltpu.VMEM((c, 1), jnp.float32),       # scale1
                        pltpu.VMEM((c, 1), jnp.float32),       # shift1
                        pltpu.VMEM((p_dim, 1), jnp.float32),   # scale2
                        pltpu.VMEM((p_dim, 1), jnp.float32),   # shift2
                        pltpu.VMEM((p_dim, 1), jnp.float32)],  # ring2
        compiler_params=pltpu.CompilerParams(
            dimension_semantics=("parallel", "arbitrary", "arbitrary",
                                 "arbitrary"),
            vmem_limit_bytes=48 * 1024 * 1024),
        cost_estimate=pl.CostEstimate(flops=flops, transcendentals=0,
                                      bytes_accessed=bytes_acc),
    )(x3, w1t, g1, b1, w2t, g2, b2)


# ---------------------------------------------------------------------------
# contrast_head forward (thin JAX glue; no transposes, no scatters)
# ---------------------------------------------------------------------------
def contrast_head_forward(x_stack, params_list, *, force_tiled=False,
                          tile_hw=None, fast_path_bytes=24 * 1024 * 1024):
    """x_stack: (3, N, C, H, W) -- x[i] is fed to branch i."""
    nb, n, c, h, w = x_stack.shape
    hw = h * w
    x3 = x_stack.reshape(nb, n, c, hw).astype(jnp.float32)   # free reshape

    # Conv weights stored (Cin, Cout); kernels want (Cout, Cin) so the output
    # channel lands on sublanes and the spatial dim on lanes.
    w1t = jnp.stack([jnp.asarray(p["w1"], jnp.float32).T for p in params_list])
    w2t = jnp.stack([jnp.asarray(p["w2"], jnp.float32).T for p in params_list])
    g1 = jnp.stack([jnp.asarray(p["g1"], jnp.float32).reshape(-1, 1)
                    for p in params_list])
    b1 = jnp.stack([jnp.asarray(p["b1"], jnp.float32).reshape(-1, 1)
                    for p in params_list])
    g2 = jnp.stack([jnp.asarray(p["g2"], jnp.float32).reshape(-1, 1)
                    for p in params_list])
    b2 = jnp.stack([jnp.asarray(p["b2"], jnp.float32).reshape(-1, 1)
                    for p in params_list])
    p_dim = w2t.shape[1]

    # fast path = whole branch (x, y1 scratch, y, double buffers) fits VMEM
    fast_bytes = 4 * n * hw * (3 * c + 2 * p_dim)
    use_fast = (not force_tiled) and fast_bytes <= fast_path_bytes and n <= 16

    if use_fast:
        y, mid, outer = fused_contrast_fast(x3, w1t, g1, b1, w2t, g2, b2,
                                            n=n, h=h, w=w)
    else:
        y, mid, outer = fused_contrast_tiled(x3, w1t, g1, b1, w2t, g2, b2,
                                             n=n, h=h, w=w, tile_hw=tile_hw)
        y = y[..., :hw]

    # Assemble (N, P, H+4, W+4): interior | middle ring (stage-1 pad constant
    # pushed through stage 2) | outer ring (stage-2 pad constant).
    inner = y.reshape(nb, n, p_dim, h, w)
    inner = jnp.pad(inner, ((0, 0), (0, 0), (0, 0), (2, 2), (2, 2)))
    hi = jnp.arange(h + 4)[:, None]
    wi = jnp.arange(w + 4)[None, :]
    is_inner = (hi >= 2) & (hi < h + 2) & (wi >= 2) & (wi < w + 2)
    is_outer = (hi == 0) | (hi == h + 3) | (wi == 0) | (wi == w + 3)
    mid_b = mid.reshape(nb, 1, p_dim, 1, 1)
    out_b = outer.reshape(nb, 1, p_dim, 1, 1)
    full = jnp.where(is_inner[None, None, None, :, :], inner,
                     jnp.where(is_outer[None, None, None, :, :], out_b, mid_b))
    return [full[i] for i in range(nb)]


# ---------------------------------------------------------------------------
# Pure-JAX reference (correctness check)
# ---------------------------------------------------------------------------
def _ref_stage(x_nhwc, w, gamma, beta):
    y = jnp.einsum("nhwc,co->nhwo", x_nhwc, w,
                   precision=jax.lax.Precision.HIGHEST)
    y = jnp.pad(y, ((0, 0), (1, 1), (1, 1), (0, 0)))
    mean = jnp.mean(y, axis=(0, 1, 2), keepdims=True)
    var = jnp.mean((y - mean) ** 2, axis=(0, 1, 2), keepdims=True)
    z = (y - mean) / jnp.sqrt(var + _EPS)
    z = z * gamma.reshape(1, 1, 1, -1) + beta.reshape(1, 1, 1, -1)
    return jnp.maximum(z, 0.0)


def _ref_branch(x_nchw, p):
    x = jnp.transpose(x_nchw, (0, 2, 3, 1)).astype(jnp.float32)
    z1 = _ref_stage(x, p["w1"], p["g1"], p["b1"])
    z2 = _ref_stage(z1, p["w2"], p["g2"], p["b2"])
    return jnp.transpose(z2, (0, 3, 1, 2))


# ---------------------------------------------------------------------------
# Deterministic synthetic parameters (shapes from the module __init__)
# ---------------------------------------------------------------------------
def init_params(key, in_channels, pre_dim):
    params = []
    for _ in range(3):
        key, k1, k2 = jax.random.split(key, 3)
        # PyTorch conv weight is (Cout, Cin, 1, 1); stored here as (Cin, Cout)
        w1 = jax.random.normal(k1, (in_channels, in_channels), jnp.float32)
        w1 = w1 / jnp.sqrt(jnp.float32(in_channels))
        w2 = jax.random.normal(k2, (in_channels, pre_dim), jnp.float32)
        w2 = w2 / jnp.sqrt(jnp.float32(in_channels))
        params.append({
            "w1": w1,
            "g1": jnp.ones((in_channels,), jnp.float32),   # BN default init
            "b1": jnp.zeros((in_channels,), jnp.float32),
            "w2": w2,
            "g2": jnp.ones((pre_dim,), jnp.float32),
            "b2": jnp.zeros((pre_dim,), jnp.float32),
        })
    return params


if __name__ == "__main__":
    key = jax.random.PRNGKey(0)
    N, C, H, W = 2, 8, 16, 16
    PRE_DIM = 16

    kx, kp = jax.random.split(key)
    # forward indexes x[0], x[1], x[2] -> stack of 3 NCHW tensors
    x = jax.random.normal(kx, (3, N, C, H, W), jnp.float32)
    params = init_params(kp, C, PRE_DIM)
    refs = [_ref_branch(x[i], params[i]) for i in range(3)]

    def check(outs, refs_, tag):
        for i, (o, r) in enumerate(zip(outs, refs_)):
            o = jax.block_until_ready(o)
            assert o.shape == r.shape, (tag, i, o.shape, r.shape)
            err = float(jnp.max(jnp.abs(o - r)))
            assert err < 1e-3, f"{tag} branch {i} mismatch, max err {err}"

    # 1) fast path: one grid step per branch, everything resident in VMEM
    outs_fast = jax.jit(contrast_head_forward)(x, params)
    check(outs_fast, refs, "fast")

    # 2) forced tiled 3-pass path (the production BlockSpec pipeline)
    tiled_fn = jax.jit(functools.partial(contrast_head_forward,
                                         force_tiled=True, tile_hw=128))
    check(tiled_fn(x, params), refs, "tiled")

    # 3) tiled path with ragged spatial extent (lane padding + masked stats)
    H2, W2 = 12, 12                      # H*W = 144 -> padded to 256, 2 tiles
    kx2, kp2 = jax.random.split(jax.random.PRNGKey(1))
    x2 = jax.random.normal(kx2, (3, N, C, H2, W2), jnp.float32)
    params2 = init_params(kp2, C, PRE_DIM)
    refs2 = [_ref_branch(x2[i], params2[i]) for i in range(3)]
    outs2 = jax.jit(functools.partial(contrast_head_forward,
                                      force_tiled=True,
                                      tile_hw=128))(x2, params2)
    check(outs2, refs2, "masked-tiled")

    print("KERNEL_OK")
</pallas_src>

<mosaic_0001>
module attributes {stable_mosaic.version = 11 : i64} {
  func.func @_fast_kernel(%arg0: i32, %arg1: memref<1x2x8x256xf32, #tpu.memory_space<vmem>>, %arg2: memref<1x8x8xf32, #tpu.memory_space<vmem>>, %arg3: memref<1x8x1xf32, #tpu.memory_space<vmem>>, %arg4: memref<1x8x1xf32, #tpu.memory_space<vmem>>, %arg5: memref<1x16x8xf32, #tpu.memory_space<vmem>>, %arg6: memref<1x16x1xf32, #tpu.memory_space<vmem>>, %arg7: memref<1x16x1xf32, #tpu.memory_space<vmem>>, %arg8: memref<1x2x16x256xf32, #tpu.memory_space<vmem>>, %arg9: memref<1x16x1xf32, #tpu.memory_space<vmem>>, %arg10: memref<1x16x1xf32, #tpu.memory_space<vmem>>, %arg11: memref<2x8x256xf32, #tpu.memory_space<vmem>>) attributes {dimension_semantics = [#tpu.dimension_semantics<parallel>], iteration_bounds = array<i64: 3>, scalar_prefetch = 0 : i64, scratch_operands = 1 : i64, tpu.core_type = #tpu.core_type<tc>, window_params = [{transform_indices = @transform_0, window_bounds = array<i64: 1, 2, 8, 256>}, {transform_indices = @transform_1, window_bounds = array<i64: 1, 8, 8>}, {transform_indices = @transform_2, window_bounds = array<i64: 1, 8, 1>}, {transform_indices = @transform_3, window_bounds = array<i64: 1, 8, 1>}, {transform_indices = @transform_4, window_bounds = array<i64: 1, 16, 8>}, {transform_indices = @transform_5, window_bounds = array<i64: 1, 16, 1>}, {transform_indices = @transform_6, window_bounds = array<i64: 1, 16, 1>}, {transform_indices = @transform_7, window_bounds = array<i64: 1, 2, 16, 256>}, {transform_indices = @transform_8, window_bounds = array<i64: 1, 16, 1>}, {transform_indices = @transform_9, window_bounds = array<i64: 1, 16, 1>}]} {
    %c0 = arith.constant 0 : index
    %c0_0 = arith.constant 0 : index
    %c0_1 = arith.constant 0 : index
    %0 = vector.load %arg2[%c0, %c0_0, %c0_1] : memref<1x8x8xf32, #tpu.memory_space<vmem>>, vector<1x8x8xf32>
    %1 = vector.shape_cast %0 : vector<1x8x8xf32> to vector<8x8xf32>
    %c0_2 = arith.constant 0 : index
    %c0_3 = arith.constant 0 : index
    %c0_4 = arith.constant 0 : index
    %2 = vector.load %arg5[%c0_2, %c0_3, %c0_4] : memref<1x16x8xf32, #tpu.memory_space<vmem>>, vector<1x16x8xf32>
    %3 = vector.shape_cast %2 : vector<1x16x8xf32> to vector<16x8xf32>
    %cst = arith.constant 0.000000e+00 : f32
    %4 = vector.broadcast %cst : f32 to vector<8x1xf32>
    %cst_5 = arith.constant 0.000000e+00 : f32
    %5 = vector.broadcast %cst_5 : f32 to vector<8x1xf32>
    %c0_6 = arith.constant 0 : index
    %c0_7 = arith.constant 0 : index
    %c0_8 = arith.constant 0 : index
    %c0_9 = arith.constant 0 : index
    %6 = vector.load %arg1[%c0_6, %c0_7, %c0_8, %c0_9] : memref<1x2x8x256xf32, #tpu.memory_space<vmem>>, vector<1x1x8x256xf32>
    %7 = vector.shape_cast %6 : vector<1x1x8x256xf32> to vector<8x256xf32>
    %cst_10 = arith.constant dense<0.000000e+00> : vector<8x256xf32>
    %8 = tpu.matmul %1, %7, %cst_10 {dimension_numbers = #tpu.dot_dimension_numbers<[1], [0], [0], [1], [0, 0, 1, 1], [], []>, precision = #tpu.contract_precision<fp32>} : vector<8x8xf32>, vector<8x256xf32>, vector<8x256xf32> -> vector<8x256xf32>
    %c0_11 = arith.constant 0 : index
    %c0_12 = arith.constant 0 : index
    %c0_13 = arith.constant 0 : index
    %9 = vector.load %arg11[%c0_11, %c0_12, %c0_13] : memref<2x8x256xf32, #tpu.memory_space<vmem>>, vector<1x8x256xf32>
    %10 = vector.shape_cast %9 : vector<1x8x256xf32> to vector<8x256xf32>
    %11 = vector.shape_cast %8 : vector<8x256xf32> to vector<1x8x256xf32>
    tpu.vector_store %arg11[%c0_11, %c0_12, %c0_13], %11 {strides = array<i32>} : memref<2x8x256xf32, #tpu.memory_space<vmem>>, vector<1x8x256xf32>,
    %cst_14 = arith.constant dense<0.000000e+00> : vector<8xf32>
    %12 = vector.multi_reduction <add>, %8, %cst_14 [1] : vector<8x256xf32> to vector<8xf32>
    %13 = vector.shape_cast %12 : vector<8xf32> to vector<8x1xf32>
    %14 = arith.addf %4, %13 : vector<8x1xf32>
    %15 = arith.mulf %8, %8 : vector<8x256xf32>
    %cst_15 = arith.constant dense<0.000000e+00> : vector<8xf32>
    %16 = vector.multi_reduction <add>, %15, %cst_15 [1] : vector<8x256xf32> to vector<8xf32>
    %17 = vector.shape_cast %16 : vector<8xf32> to vector<8x1xf32>
    %18 = arith.addf %5, %17 : vector<8x1xf32>
    %c0_16 = arith.constant 0 : index
    %c1 = arith.constant 1 : index
    %c0_17 = arith.constant 0 : index
    %c0_18 = arith.constant 0 : index
    %19 = vector.load %arg1[%c0_16, %c1, %c0_17, %c0_18] : memref<1x2x8x256xf32, #tpu.memory_space<vmem>>, vector<1x1x8x256xf32>
    %20 = vector.shape_cast %19 : vector<1x1x8x256xf32> to vector<8x256xf32>
    %cst_19 = arith.constant dense<0.000000e+00> : vector<8x256xf32>
    %21 = tpu.matmul %1, %20, %cst_19 {dimension_numbers = #tpu.dot_dimension_numbers<[1], [0], [0], [1], [0, 0, 1, 1], [], []>, precision = #tpu.contract_precision<fp32>} : vector<8x8xf32>, vector<8x256xf32>, vector<8x256xf32> -> vector<8x256xf32>
    %c1_20 = arith.constant 1 : index
    %c0_21 = arith.constant 0 : index
    %c0_22 = arith.constant 0 : index
    %22 = vector.load %arg11[%c1_20, %c0_21, %c0_22] : memref<2x8x256xf32, #tpu.memory_space<vmem>>, vector<1x8x256xf32>
    %23 = vector.shape_cast %22 : vector<1x8x256xf32> to vector<8x256xf32>
    %24 = vector.shape_cast %21 : vector<8x256xf32> to vector<1x8x256xf32>
    tpu.vector_store %arg11[%c1_20, %c0_21, %c0_22], %24 {strides = array<i32>} : memref<2x8x256xf32, #tpu.memory_space<vmem>>, vector<1x8x256xf32>,
    %cst_23 = arith.constant dense<0.000000e+00> : vector<8xf32>
    %25 = vector.multi_reduction <add>, %21, %cst_23 [1] : vector<8x256xf32> to vector<8xf32>
    %26 = vector.shape_cast %25 : vector<8xf32> to vector<8x1xf32>
    %27 = arith.addf %14, %26 : vector<8x1xf32>
    %28 = arith.mulf %21, %21 : vector<8x256xf32>
    %cst_24 = arith.constant dense<0.000000e+00> : vector<8xf32>
    %29 = vector.multi_reduction <add>, %28, %cst_24 [1] : vector<8x256xf32> to vector<8xf32>
    %30 = vector.shape_cast %29 : vector<8xf32> to vector<8x1xf32>
    %31 = arith.addf %18, %30 : vector<8x1xf32>
    %cst_25 = arith.constant 0.00154320989 : f32
    %32 = vector.broadcast %cst_25 : f32 to vector<8x1xf32>
    %33 = arith.mulf %27, %32 : vector<8x1xf32>
    %cst_26 = arith.constant 0.00154320989 : f32
    %34 = vector.broadcast %cst_26 : f32 to vector<8x1xf32>
    %35 = arith.mulf %31, %34 : vector<8x1xf32>
    %36 = arith.mulf %33, %33 : vector<8x1xf32>
    %37 = arith.subf %35, %36 : vector<8x1xf32>
    %cst_27 = arith.constant 0.000000e+00 : f32
    %38 = vector.broadcast %cst_27 : f32 to vector<8x1xf32>
    %39 = arith.maximumf %37, %38 : vector<8x1xf32>
    %cst_28 = arith.constant 9.99999974E-6 : f32
    %40 = vector.broadcast %cst_28 : f32 to vector<8x1xf32>
    %41 = arith.addf %39, %40 : vector<8x1xf32>
    %42 = math.rsqrt %41 : vector<8x1xf32>
    %c0_29 = arith.constant 0 : index
    %c0_30 = arith.constant 0 : index
    %c0_31 = arith.constant 0 : index
    %43 = vector.load %arg3[%c0_29, %c0_30, %c0_31] : memref<1x8x1xf32, #tpu.memory_space<vmem>>, vector<1x8x1xf32>
    %44 = vector.shape_cast %43 : vector<1x8x1xf32> to vector<8x1xf32>
    %45 = arith.mulf %42, %44 : vector<8x1xf32>
    %c0_32 = arith.constant 0 : index
    %c0_33 = arith.constant 0 : index
    %c0_34 = arith.constant 0 : index
    %46 = vector.load %arg4[%c0_32, %c0_33, %c0_34] : memref<1x8x1xf32, #tpu.memory_space<vmem>>, vector<1x8x1xf32>
    %47 = vector.shape_cast %46 : vector<1x8x1xf32> to vector<8x1xf32>
    %48 = arith.mulf %33, %45 : vector<8x1xf32>
    %49 = arith.subf %47, %48 : vector<8x1xf32>
    %cst_35 = arith.constant 0.000000e+00 : f32
    %50 = vector.broadcast %cst_35 : f32 to vector<8x1xf32>
    %51 = arith.maximumf %49, %50 : vector<8x1xf32>
    %52 = vector.shape_cast %51 : vector<8x1xf32> to vector<8x1xf32>
    %53 = vector.broadcast %52 : vector<8x1xf32> to vector<8x128xf32>
    %cst_36 = arith.constant dense<0.000000e+00> : vector<16x128xf32>
    %54 = tpu.matmul %3, %53, %cst_36 {dimension_numbers = #tpu.dot_dimension_numbers<[1], [0], [0], [1], [0, 0, 1, 1], [], []>, precision = #tpu.contract_precision<fp32>} : vector<16x8xf32>, vector<8x128xf32>, vector<16x128xf32> -> vector<16x128xf32>
    %55 = vector.extract_strided_slice %54 {offsets = [0, 0], sizes = [16, 1], strides = [1, 1]} : vector<16x128xf32> to vector<16x1xf32>
    %cst_37 = arith.constant 1.360000e+02 : f32
    %56 = vector.broadcast %cst_37 : f32 to vector<16x1xf32>
    %57 = arith.mulf %56, %55 : vector<16x1xf32>
    %58 = arith.mulf %55, %55 : vector<16x1xf32>
    %cst_38 = arith.constant 1.360000e+02 : f32
    %59 = vector.broadcast %cst_38 : f32 to vector<16x1xf32>
    %60 = arith.mulf %59, %58 : vector<16x1xf32>
    %c0_39 = arith.constant 0 : index
    %c0_40 = arith.constant 0 : index
    %c0_41 = arith.constant 0 : index
    %61 = vector.load %arg11[%c0_39, %c0_40, %c0_41] : memref<2x8x256xf32, #tpu.memory_space<vmem>>, vector<1x8x256xf32>
    %62 = vector.shape_cast %61 : vector<1x8x256xf32> to vector<8x256xf32>
    %63 = vector.broadcast %45 : vector<8x1xf32> to vector<8x256xf32>
    %64 = arith.mulf %62, %63 : vector<8x256xf32>
    %65 = vector.broadcast %49 : vector<8x1xf32> to vector<8x256xf32>
    %66 = arith.addf %64, %65 : vector<8x256xf32>
    %cst_42 = arith.constant 0.000000e+00 : f32
    %67 = vector.broadcast %cst_42 : f32 to vector<8x256xf32>
    %68 = arith.maximumf %66, %67 : vector<8x256xf32>
    %cst_43 = arith.constant dense<0.000000e+00> : vector<16x256xf32>
    %69 = tpu.matmul %3, %68, %cst_43 {dimension_numbers = #tpu.dot_dimension_numbers<[1], [0], [0], [1], [0, 0, 1, 1], [], []>, precision = #tpu.contract_precision<fp32>} : vector<16x8xf32>, vector<8x256xf32>, vector<16x256xf32> -> vector<16x256xf32>
    %c0_44 = arith.constant 0 : index
    %c0_45 = arith.constant 0 : index
    %c0_46 = arith.constant 0 : index
    %c0_47 = arith.constant 0 : index
    %70 = vector.load %arg8[%c0_44, %c0_45, %c0_46, %c0_47] : memref<1x2x16x256xf32, #tpu.memory_space<vmem>>, vector<1x1x16x256xf32>
    %71 = vector.shape_cast %70 : vector<1x1x16x256xf32> to vector<16x256xf32>
    %72 = vector.shape_cast %69 : vector<16x256xf32> to vector<1x1x16x256xf32>
    tpu.vector_store %arg8[%c0_44, %c0_45, %c0_46, %c0_47], %72 {strides = array<i32>} : memref<1x2x16x256xf32, #tpu.memory_space<vmem>>, vector<1x1x16x256xf32>,
    %cst_48 = arith.constant dense<0.000000e+00> : vector<16xf32>
    %73 = vector.multi_reduction <add>, %69, %cst_48 [1] : vector<16x256xf32> to vector<16xf32>
    %74 = vector.shape_cast %73 : vector<16xf32> to vector<16x1xf32>
    %75 = arith.addf %57, %74 : vector<16x1xf32>
    %76 = arith.mulf %69, %69 : vector<16x256xf32>
    %cst_49 = arith.constant dense<0.000000e+00> : vector<16xf32>
    %77 = vector.multi_reduction <add>, %76, %cst_49 [1] : vector<16x256xf32> to vector<16xf32>
    %78 = vector.shape_cast %77 : vector<16xf32> to vector<16x1xf32>
    %79 = arith.addf %60, %78 : vector<16x1xf32>
    %c1_50 = arith.constant 1 : index
    %c0_51 = arith.constant 0 : index
    %c0_52 = arith.constant 0 : index
    %80 = vector.load %arg11[%c1_50, %c0_51, %c0_52] : memref<2x8x256xf32, #tpu.memory_space<vmem>>, vector<1x8x256xf32>
    %81 = vector.shape_cast %80 : vector<1x8x256xf32> to vector<8x256xf32>
    %82 = vector.broadcast %45 : vector<8x1xf32> to vector<8x256xf32>
    %83 = arith.mulf %81, %82 : vector<8x256xf32>
    %84 = vector.broadcast %49 : vector<8x1xf32> to vector<8x256xf32>
    %85 = arith.addf %83, %84 : vector<8x256xf32>
    %cst_53 = arith.constant 0.000000e+00 : f32
    %86 = vector.broadcast %cst_53 : f32 to vector<8x256xf32>
    %87 = arith.maximumf %85, %86 : vector<8x256xf32>
    %cst_54 = arith.constant dense<0.000000e+00> : vector<16x256xf32>
    %88 = tpu.matmul %3, %87, %cst_54 {dimension_numbers = #tpu.dot_dimension_numbers<[1], [0], [0], [1], [0, 0, 1, 1], [], []>, precision = #tpu.contract_precision<fp32>} : vector<16x8xf32>, vector<8x256xf32>, vector<16x256xf32> -> vector<16x256xf32>
    %c0_55 = arith.constant 0 : index
    %c1_56 = arith.constant 1 : index
    %c0_57 = arith.constant 0 : index
    %c0_58 = arith.constant 0 : index
    %89 = vector.load %arg8[%c0_55, %c1_56, %c0_57, %c0_58] : memref<1x2x16x256xf32, #tpu.memory_space<vmem>>, vector<1x1x16x256xf32>
    %90 = vector.shape_cast %89 : vector<1x1x16x256xf32> to vector<16x256xf32>
    %91 = vector.shape_cast %88 : vector<16x256xf32> to vector<1x1x16x256xf32>
    tpu.vector_store %arg8[%c0_55, %c1_56, %c0_57, %c0_58], %91 {strides = array<i32>} : memref<1x2x16x256xf32, #tpu.memory_space<vmem>>, vector<1x1x16x256xf32>,
    %cst_59 = arith.constant dense<0.000000e+00> : vector<16xf32>
    %92 = vector.multi_reduction <add>, %88, %cst_59 [1] : vector<16x256xf32> to vector<16xf32>
    %93 = vector.shape_cast %92 : vector<16xf32> to vector<16x1xf32>
    %94 = arith.addf %75, %93 : vector<16x1xf32>
    %95 = arith.mulf %88, %88 : vector<16x256xf32>
    %cst_60 = arith.constant dense<0.000000e+00> : vector<16xf32>
    %96 = vector.multi_reduction <add>, %95, %cst_60 [1] : vector<16x256xf32> to vector<16xf32>
    %97 = vector.shape_cast %96 : vector<16xf32> to vector<16x1xf32>
    %98 = arith.addf %79, %97 : vector<16x1xf32>
    %cst_61 = arith.constant 1.250000e-03 : f32
    %99 = vector.broadcast %cst_61 : f32 to vector<16x1xf32>
    %100 = arith.mulf %94, %99 : vector<16x1xf32>
    %cst_62 = arith.constant 1.250000e-03 : f32
    %101 = vector.broadcast %cst_62 : f32 to vector<16x1xf32>
    %102 = arith.mulf %98, %101 : vector<16x1xf32>
    %103 = arith.mulf %100, %100 : vector<16x1xf32>
    %104 = arith.subf %102, %103 : vector<16x1xf32>
    %cst_63 = arith.constant 0.000000e+00 : f32
    %105 = vector.broadcast %cst_63 : f32 to vector<16x1xf32>
    %106 = arith.maximumf %104, %105 : vector<16x1xf32>
    %cst_64 = arith.constant 9.99999974E-6 : f32
    %107 = vector.broadcast %cst_64 : f32 to vector<16x1xf32>
    %108 = arith.addf %106, %107 : vector<16x1xf32>
    %109 = math.rsqrt %108 : vector<16x1xf32>
    %c0_65 = arith.constant 0 : index
    %c0_66 = arith.constant 0 : index
    %c0_67 = arith.constant 0 : index
    %110 = vector.load %arg6[%c0_65, %c0_66, %c0_67] : memref<1x16x1xf32, #tpu.memory_space<vmem>>, vector<1x16x1xf32>
    %111 = vector.shape_cast %110 : vector<1x16x1xf32> to vector<16x1xf32>
    %112 = arith.mulf %109, %111 : vector<16x1xf32>
    %c0_68 = arith.constant 0 : index
    %c0_69 = arith.constant 0 : index
    %c0_70 = arith.constant 0 : index
    %113 = vector.load %arg7[%c0_68, %c0_69, %c0_70] : memref<1x16x1xf32, #tpu.memory_space<vmem>>, vector<1x16x1xf32>
    %114 = vector.shape_cast %113 : vector<1x16x1xf32> to vector<16x1xf32>
    %115 = arith.mulf %100, %112 : vector<16x1xf32>
    %116 = arith.subf %114, %115 : vector<16x1xf32>
    %c0_71 = arith.constant 0 : index
    %c0_72 = arith.constant 0 : index
    %c0_73 = arith.constant 0 : index
    %c0_74 = arith.constant 0 : index
    %117 = vector.load %arg8[%c0_71, %c0_72, %c0_73, %c0_74] : memref<1x2x16x256xf32, #tpu.memory_space<vmem>>, vector<1x1x16x256xf32>
    %118 = vector.shape_cast %117 : vector<1x1x16x256xf32> to vector<16x256xf32>
    %119 = vector.broadcast %112 : vector<16x1xf32> to vector<16x256xf32>
    %120 = arith.mulf %118, %119 : vector<16x256xf32>
    %121 = vector.broadcast %116 : vector<16x1xf32> to vector<16x256xf32>
    %122 = arith.addf %120, %121 : vector<16x256xf32>
    %cst_75 = arith.constant 0.000000e+00 : f32
    %123 = vector.broadcast %cst_75 : f32 to vector<16x256xf32>
    %124 = arith.maximumf %122, %123 : vector<16x256xf32>
    %c0_76 = arith.constant 0 : index
    %c0_77 = arith.constant 0 : index
    %c0_78 = arith.constant 0 : index
    %c0_79 = arith.constant 0 : index
    %125 = vector.load %arg8[%c0_76, %c0_77, %c0_78, %c0_79] : memref<1x2x16x256xf32, #tpu.memory_space<vmem>>, vector<1x1x16x256xf32>
    %126 = vector.shape_cast %125 : vector<1x1x16x256xf32> to vector<16x256xf32>
    %127 = vector.shape_cast %124 : vector<16x256xf32> to vector<1x1x16x256xf32>
    tpu.vector_store %arg8[%c0_76, %c0_77, %c0_78, %c0_79], %127 {strides = array<i32>} : memref<1x2x16x256xf32, #tpu.memory_space<vmem>>, vector<1x1x16x256xf32>,
    %c0_80 = arith.constant 0 : index
    %c1_81 = arith.constant 1 : index
    %c0_82 = arith.constant 0 : index
    %c0_83 = arith.constant 0 : index
    %128 = vector.load %arg8[%c0_80, %c1_81, %c0_82, %c0_83] : memref<1x2x16x256xf32, #tpu.memory_space<vmem>>, vector<1x1x16x256xf32>
    %129 = vector.shape_cast %128 : vector<1x1x16x256xf32> to vector<16x256xf32>
    %130 = vector.broadcast %112 : vector<16x1xf32> to vector<16x256xf32>
    %131 = arith.mulf %129, %130 : vector<16x256xf32>
    %132 = vector.broadcast %116 : vector<16x1xf32> to vector<16x256xf32>
    %133 = arith.addf %131, %132 : vector<16x256xf32>
    %cst_84 = arith.constant 0.000000e+00 : f32
    %134 = vector.broadcast %cst_84 : f32 to vector<16x256xf32>
    %135 = arith.maximumf %133, %134 : vector<16x256xf32>
    %c0_85 = arith.constant 0 : index
    %c1_86 = arith.constant 1 : index
    %c0_87 = arith.constant 0 : index
    %c0_88 = arith.constant 0 : index
    %136 = vector.load %arg8[%c0_85, %c1_86, %c0_87, %c0_88] : memref<1x2x16x256xf32, #tpu.memory_space<vmem>>, vector<1x1x16x256xf32>
    %137 = vector.shape_cast %136 : vector<1x1x16x256xf32> to vector<16x256xf32>
    %138 = vector.shape_cast %135 : vector<16x256xf32> to vector<1x1x16x256xf32>
    tpu.vector_store %arg8[%c0_85, %c1_86, %c0_87, %c0_88], %138 {strides = array<i32>} : memref<1x2x16x256xf32, #tpu.memory_space<vmem>>, vector<1x1x16x256xf32>,
    %139 = arith.mulf %55, %112 : vector<16x1xf32>
    %140 = arith.addf %139, %116 : vector<16x1xf32>
    %cst_89 = arith.constant 0.000000e+00 : f32
    %141 = vector.broadcast %cst_89 : f32 to vector<16x1xf32>
    %142 = arith.maximumf %140, %141 : vector<16x1xf32>
    %c0_90 = arith.constant 0 : index
    %c0_91 = arith.constant 0 : index
    %c0_92 = arith.constant 0 : index
    %143 = vector.load %arg9[%c0_90, %c0_91, %c0_92] : memref<1x16x1xf32, #tpu.memory_space<vmem>>, vector<1x16x1xf32>
    %144 = vector.shape_cast %143 : vector<1x16x1xf32> to vector<16x1xf32>
    %145 = vector.shape_cast %142 : vector<16x1xf32> to vector<1x16x1xf32>
    tpu.vector_store %arg9[%c0_90, %c0_91, %c0_92], %145 {strides = array<i32>} : memref<1x16x1xf32, #tpu.memory_space<vmem>>, vector<1x16x1xf32>,
    %cst_93 = arith.constant 0.000000e+00 : f32
    %146 = vector.broadcast %cst_93 : f32 to vector<16x1xf32>
    %147 = arith.maximumf %116, %146 : vector<16x1xf32>
    %c0_94 = arith.constant 0 : index
    %c0_95 = arith.constant 0 : index
    %c0_96 = arith.constant 0 : index
    %148 = vector.load %arg10[%c0_94, %c0_95, %c0_96] : memref<1x16x1xf32, #tpu.memory_space<vmem>>, vector<1x16x1xf32>
    %149 = vector.shape_cast %148 : vector<1x16x1xf32> to vector<16x1xf32>
    %150 = vector.shape_cast %147 : vector<16x1xf32> to vector<1x16x1xf32>
    tpu.vector_store %arg10[%c0_94, %c0_95, %c0_96], %150 {strides = array<i32>} : memref<1x16x1xf32, #tpu.memory_space<vmem>>, vector<1x16x1xf32>,
    return
  }
  func.func @transform_0(%arg0: i32) -> (i32, i32, i32, i32) {
    %c0_i32 = arith.constant 0 : i32
    %c0_i32_0 = arith.constant 0 : i32
    %c0_i32_1 = arith.constant 0 : i32
    %c0_i32_2 = arith.constant 0 : i32
    return %arg0, %c0_i32, %c0_i32_0, %c0_i32_1 : i32, i32, i32, i32
  }
  func.func @transform_1(%arg0: i32) -> (i32, i32, i32) {
    %c0_i32 = arith.constant 0 : i32
    %c0_i32_0 = arith.constant 0 : i32
    %c0_i32_1 = arith.constant 0 : i32
    return %arg0, %c0_i32, %c0_i32_0 : i32, i32, i32
  }
  func.func @transform_2(%arg0: i32) -> (i32, i32, i32) {
    %c0_i32 = arith.constant 0 : i32
    %c0_i32_0 = arith.constant 0 : i32
    %c0_i32_1 = arith.constant 0 : i32
    return %arg0, %c0_i32, %c0_i32_0 : i32, i32, i32
  }
  func.func @transform_3(%arg0: i32) -> (i32, i32, i32) {
    %c0_i32 = arith.constant 0 : i32
    %c0_i32_0 = arith.constant 0 : i32
    %c0_i32_1 = arith.constant 0 : i32
    return %arg0, %c0_i32, %c0_i32_0 : i32, i32, i32
  }
  func.func @transform_4(%arg0: i32) -> (i32, i32, i32) {
    %c0_i32 = arith.constant 0 : i32
    %c0_i32_0 = arith.constant 0 : i32
    %c0_i32_1 = arith.constant 0 : i32
    return %arg0, %c0_i32, %c0_i32_0 : i32, i32, i32
  }
  func.func @transform_5(%arg0: i32) -> (i32, i32, i32) {
    %c0_i32 = arith.constant 0 : i32
    %c0_i32_0 = arith.constant 0 : i32
    %c0_i32_1 = arith.constant 0 : i32
    return %arg0, %c0_i32, %c0_i32_0 : i32, i32, i32
  }
  func.func @transform_6(%arg0: i32) -> (i32, i32, i32) {
    %c0_i32 = arith.constant 0 : i32
    %c0_i32_0 = arith.constant 0 : i32
    %c0_i32_1 = arith.constant 0 : i32
    return %arg0, %c0_i32, %c0_i32_0 : i32, i32, i32
  }
  func.func @transform_7(%arg0: i32) -> (i32, i32, i32, i32) {
    %c0_i32 = arith.constant 0 : i32
    %c0_i32_0 = arith.constant 0 : i32
    %c0_i32_1 = arith.constant 0 : i32
    %c0_i32_2 = arith.constant 0 : i32
    return %arg0, %c0_i32, %c0_i32_0, %c0_i32_1 : i32, i32, i32, i32
  }
  func.func @transform_8(%arg0: i32) -> (i32, i32, i32) {
    %c0_i32 = arith.constant 0 : i32
    %c0_i32_0 = arith.constant 0 : i32
    %c0_i32_1 = arith.constant 0 : i32
    return %arg0, %c0_i32, %c0_i32_0 : i32, i32, i32
  }
  func.func @transform_9(%arg0: i32) -> (i32, i32, i32) {
    %c0_i32 = arith.constant 0 : i32
    %c0_i32_0 = arith.constant 0 : i32
    %c0_i32_1 = arith.constant 0 : i32
    return %arg0, %c0_i32, %c0_i32_0 : i32, i32, i32
  }
}

</mosaic_0001>

<bundles_post_ra>
// kernel: contrast_head_forward.1
= control target key start
LH: loop header
LB: loop body
LE: loop exit
PB: predicated region body
PF: predicated region fallthrough
CT: control target
= control target key end

     0   :  { %s3519_s30 = smov 0   ;;  %s3785_s0 = inlined_call_operand.vmem [shape: f32[3,2,8,256], index: 0, kind: input, shape index: {}]   ;;  %s3786_s1 = inlined_call_operand.vmem [shape: f32[3,8,8], index: 1, kind: input, shape index: {}]   ;;  %s3787_s2 = inlined_call_operand.vmem [shape: f32[3,8,1], index: 2, kind: input, shape index: {}]   ;;  %s3788_s3 = inlined_call_operand.vmem [shape: f32[3,8,1], index: 3, kind: input, shape index: {}]   ;;  %s3789_s4 = inlined_call_operand.vmem [shape: f32[3,16,8], index: 4, kind: input, shape index: {}]   ;;  %s3790_s5 = inlined_call_operand.vmem [shape: f32[3,16,1], index: 5, kind: input, shape index: {}]   ;;  %s3791_s6 = inlined_call_operand.vmem [shape: f32[3,16,1], index: 6, kind: input, shape index: {}]   ;;  %s3792_s7 = inlined_call_operand.vmem [shape: f32[3,2,16,256], index: 7, kind: output, shape index: {0}]   ;;  %s3793_s8 = inlined_call_operand.vmem [shape: f32[3,16,1], index: 8, kind: output, shape index: {1}]   ;;  %s3794_s9 = inlined_call_operand.vmem [shape: f32[3,16,1], index: 9, kind: output, shape index: {2}]  }
   0x1 LB: > { %s3348_s10 = sadd.s32 4294967295, %s3465_s30   ;;  %p3352_p0 = scmp.ge.s32.totalorder %s3465_s30, 1  ;;  %s3465_s30 = sphi %s3519_s30, %s20_s30  }
   0x2   : > { %p349_p1 = scmp.lt.s32.totalorder %s3465_s30, 4 }
   0x4   : > { %p350_p2 = pnand %p3352_p0, %p349_p1 }
   0x5   : > { %p422_p3 = scmp.lt.s32.totalorder (!%p350_p2), %s3348_s10, 2 }
   0x6   : > { %353 = sbr.rel (%p350_p2) target bundleno = 1118 (0x45e), region = 48 }
   0xb   : > { %v3467_v0 = vmov 0.0   ;;  %s3796_s10 = smov (!%p422_p3, %s3348_s10), 2  ;;  %vm474_vm0 = vcmask 64512   ;;  %vm3148_vm1 = vcmask 7168  }
   0xc   : > { %544 = vmatprep.mubr.f32.mxu0 %v3467_v0  ;;  %630 = vmatprep.mubr.f32.mxu1 %v3467_v0  ;;  %s3386_s11 = sshll.u32 %s3796_s10, 5  ;;  %s3536_s15 = sshll.u32 %s3796_s10, 3 }
   0xd   : > { %s426_s14 = scalar_lea.vmem %s3785_s0, %s3386_s11  ;;  %s430_s18 = scalar_lea.vmem %s3786_s1, %s3536_s15 }
   0xe   : > { %v473_v1 = vld [vmem:[%s426_s14 + $0x8] sm:$0xff]  ;;  %v472_v2 = vld [vmem:[%s426_s14] sm:$0xff]  ;;  %v3371_v3 = vld [vmem:[%s426_s14 + $0x18] sm:$0xff]  ;;  %s3580_s19 = sshll.u32 %s3796_s10, 4  ;;  %s434_s25 = scalar_lea.vmem %s3787_s2, %s3536_s15 }
   0xf   : > { %v508_v4 = vand.u32 4294901760, %v473_v1  ;;  %v510_v5 = vand.u32 4294901760, %v472_v2  ;;  %v3542_v6 = vand.u32 4294901760, %v3371_v3  ;;  %v3370_v7 = vld [vmem:[%s426_s14 + $0x10] sm:$0xff]  ;;  %v469_v8 = vld [vmem:[%s430_s18] sm:$0xff]  ;;  %s443_s22 = scalar_lea.vmem %s3789_s4, %s3580_s19  ;;  %s438_s28 = scalar_lea.vmem %s3788_s3, %s3536_s15 }
  0x10   : > { %v990_v9 = vand.u32 4294901760, %v3370_v7  ;;  %v476_v11 = vsel %vm474_vm0, %v469_v8, 0  ;;  %s448_s12 = scalar_lea.vmem %s3790_s5, %s3580_s19  ;;  %s453_s15 = scalar_lea.vmem %s3791_s6, %s3580_s19 }
  0x11   : > { %509 = vmatprep.subr.mxu0 %v508_v4  ;;  %v587_v10 = vsub.f32 %v473_v1, %v508_v4  ;;  %v593_v12 = vsub.f32 %v472_v2, %v510_v5  ;;  %v545_v13 = vand.u32 4294901760, %v476_v11  ;;  %v1067_v16 = vsub.f32 %v3371_v3, %v3542_v6  ;;  %s468_s18 = scalar_lea.vmem %s3794_s9, %s3580_s19  ;;  %s3390_s23 = sshll.u32 %s3796_s10, 6 }
  0x12   : > { %511 = vmatpush1.msra.mxu0 %v510_v5  ;;  %v1073_v18 = vsub.f32 %v3370_v7, %v990_v9 }
  0x13   : > { %v588_v14 = vand.u32 4294901760, %v587_v10  ;;  %v594_v15 = vand.u32 4294901760, %v593_v12  ;;  %670 = vmatprep.subr.mxu0 %v587_v10  ;;  %v546_v17 = vsub.f32 %v476_v11, %v545_v13  ;;  %v1068_v24 = vand.u32 4294901760, %v1067_v16 }
  0x14   : > { %v1074_v26 = vand.u32 4294901760, %v1073_v18 }
  0x15   : > { %v589_v19 = vsub.f32 %v587_v10, %v588_v14  ;;  %v595_v20 = vsub.f32 %v593_v12, %v594_v15  ;;  %v547_v21 = vand.u32 4294901760, %v546_v17  ;;  %v1069_v28 = vsub.f32 %v1067_v16, %v1068_v24 }
  0x16   : > { %v1075_v29 = vsub.f32 %v1073_v18, %v1074_v26 }
  0x17   : > { %v590_v22 = vand.u32 4294901760, %v589_v19  ;;  %v596_v23 = vand.u32 4294901760, %v595_v20  ;;  %v548_v25 = vsub.f32 %v546_v17, %v547_v21  ;;  %v1070_v30 = vand.u32 4294901760, %v1069_v28 }
  0x18   : > { %v1076_v31 = vand.u32 4294901760, %v1075_v29 }
  0x19   : > { %591 = vmatprep.subr.mxu1 %v590_v22  ;;  %v549_v27 = vand.u32 4294901760, %v548_v25 }
  0x1a   : > { %597 = vmatpush1.msra.mxu1 %v596_v23 }
  0x1b   : > { %632 = vmatmul.mubr.f32.vlgmr.msra.gmra.mxu1 %v545_v13  ;;  %746 = vmatprep.subr.mxu1 %v508_v4 }
  0x1c   : > { %550 = vmatmul.mubr.f32.vlgmr.msra.gmra.mxu0 %v549_v27  ;;  %748 = vmatpush1.msra.mxu1 %v510_v5 }
  0x1d   : > { %673 = vmatpush1.msra.mxu0 %v593_v12  ;;  %706 = vmatprep.mubr.f32.mxu0 %v3467_v0 }
  0x1e   : > { %781 = vmatprep.mubr.f32.mxu1 %v3467_v0  ;;  %824 = vmatprep.subr.mxu0 %v588_v14 }
  0x1f   : > { %785 = vmatmul.mubr.f32.vlgmr.msra.gmra.mxu1 %v547_v21  ;;  %900 = vmatprep.subr.mxu1 %v508_v4 }
  0x20   : > { %709 = vmatmul.mubr.f32.vlgmr.msra.gmra.mxu0 %v546_v17  ;;  %902 = vmatpush1.msra.mxu1 %v510_v5 }
  0x21   : > { %828 = vmatpush1.msra.mxu0 %v594_v15  ;;  %861 = vmatprep.mubr.f32.mxu0 %v3467_v0 }
  0x22   : > { %935 = vmatprep.mubr.f32.mxu1 %v3467_v0  ;;  %989 = vmatprep.subr.mxu0 %v3542_v6 }
  0x23   : > { %937 = vmatmul.mubr.f32.vlgmr.msra.gmra.mxu1 %v545_v13  ;;  %1071 = vmatprep.subr.mxu1 %v1070_v30 }
  0x24   : > { %863 = vmatmul.mubr.f32.vlgmr.msra.gmra.mxu0 %v545_v13  ;;  %1077 = vmatpush1.msra.mxu1 %v1076_v31 }
  0x25   : > { %991 = vmatpush1.msra.mxu0 %v990_v9  ;;  %1024 = vmatprep.mubr.f32.mxu0 %v3467_v0 }
  0x26   : > { %1110 = vmatprep.mubr.f32.mxu1 %v3467_v0  ;;  %1150 = vmatprep.subr.mxu0 %v1067_v16 }
  0x27   : > { %1112 = vmatmul.mubr.f32.vlgmr.msra.gmra.mxu1 %v545_v13  ;;  %1226 = vmatprep.subr.mxu1 %v3542_v6 }
  0x28   : > { %1030 = vmatmul.mubr.f32.vlgmr.msra.gmra.mxu0 %v549_v27  ;;  %1228 = vmatpush1.msra.mxu1 %v990_v9 }
  0x29   : > { %1153 = vmatpush1.msra.mxu0 %v1073_v18  ;;  %1186 = vmatprep.mubr.f32.mxu0 %v3467_v0 }
  0x2a   : > { %1261 = vmatprep.mubr.f32.mxu1 %v3467_v0  ;;  %1304 = vmatprep.subr.mxu0 %v1068_v24 }
  0x2b   : > { %1265 = vmatmul.mubr.f32.vlgmr.msra.gmra.mxu1 %v547_v21  ;;  %1380 = vmatprep.subr.mxu1 %v3542_v6  ;;  %v3468_v21 = vmov 0  }
  0x2c   : > { %1189 = vmatmul.mubr.f32.vlgmr.msra.gmra.mxu0 %v546_v17  ;;  %1382 = vmatpush1.msra.mxu1 %v990_v9 }
  0x2d   : > { %1308 = vmatpush1.msra.mxu0 %v1074_v26  ;;  %1341 = vmatprep.mubr.f32.mxu0 %v3467_v0 }
  0x2e   : > { %1415 = vmatprep.mubr.f32.mxu1 %v3467_v0  ;;  %3452 = vset.pattern.permute.xlu1 %v3468_v21 }
  0x2f   : > { %1417 = vmatmul.mubr.f32.vlgmr.msra.gmra.mxu1 %v545_v13  ;;  %3451 = vset.pattern.permute.xlu0 %v3468_v21 }
  0x30   : > { %1343 = vmatmul.mubr.f32.vlgmr.msra.gmra.mxu0 %v545_v13 }
  0xdb   : > { %v633_v32 = vpop.f32.mrf.mxu1 }
  0xdc   : > { %v551_v33 = vpop.f32.mrf.mxu0 }
  0xdd   : > { %v634_v34 = vadd.f32 %v633_v32, %v551_v33  ;;  %v635_v35 = vpop.f32.mrf.mxu1 }
  0xde   : > { %v553_v36 = vpop.f32.mrf.mxu0 }
  0xdf   : > { %v636_v37 = vadd.f32 %v635_v35, %v553_v36  ;;  %v786_v38 = vpop.f32.mrf.mxu1  ;;  %v1443_v35 = vld [vmem:[%s434_s25] sm:$0xff]  ;;  %s458_s25 = scalar_lea.vmem %s3792_s7, %s3390_s23 }
  0xe0   : > { %v710_v39 = vpop.f32.mrf.mxu0 }
  0xe1   : > { %v711_v40 = vadd.f32 %v710_v39, %v634_v34  ;;  %v788_v41 = vpop.f32.mrf.mxu1  ;;  %v470_v34 = vld [vmem:[%s443_s22] sm:$0xff] }
  0xe2   : > { %v712_v42 = vpop.f32.mrf.mxu0  ;;  %v1455_v36 = vsel %vm474_vm0, %v470_v34, 0 }
  0xe3   : > { %v787_v43 = vadd.f32 %v786_v38, %v711_v40  ;;  %v713_v44 = vadd.f32 %v712_v42, %v636_v37  ;;  %v938_v45 = vpop.f32.mrf.mxu1  ;;  %v3595_v37 = vand.u32 4294901760, %v1455_v36 }
  0xe4   : > { %v864_v46 = vpop.f32.mrf.mxu0 }
  0xe5   : > { %v789_v47 = vadd.f32 %v788_v41, %v713_v44  ;;  %v865_v48 = vadd.f32 %v864_v46, %v787_v43  ;;  %v940_v49 = vpop.f32.mrf.mxu1  ;;  %v3598_v40 = vsub.f32 %v1455_v36, %v3595_v37  ;;  %3418 = vmatprep.mubr.f32.mxu1 %v3595_v37  ;;  %v1445_v41 = vld [vmem:[%s438_s28] sm:$0xff] }
  0xe6   : > { %v866_v50 = vpop.f32.mrf.mxu0 }
  0xe7   : > { %v3559_v51 = vadd.f32 %v938_v45, %v865_v48  ;;  %v867_v52 = vadd.f32 %v866_v50, %v789_v47  ;;  %v1113_v53 = vpop.f32.mrf.mxu1  ;;  %v3602_v43 = vand.u32 4294901760, %v3598_v40  ;;  %v471_v48 = vld [vmem:[%s443_s22 + $0x8] sm:$0xff]  ;;  %s463_s22 = scalar_lea.vmem %s3793_s8, %s3580_s19 }
  0xe8   : > { %v1031_v54 = vpop.f32.mrf.mxu0 }
  0xe9   : > { %v3561_v55 = vadd.f32 %v940_v49, %v867_v52  ;;  %v1114_v56 = vadd.f32 %v1113_v53, %v1031_v54  ;;  %v1115_v57 = vpop.f32.mrf.mxu1  ;;  %v949_v62 = vmul.f32 %v3559_v51, %v3559_v51  ;;  %v1529_v45 = vsub.f32 %v3598_v40, %v3602_v43 }
  0xea   : > { %v1033_v58 = vpop.f32.mrf.mxu0  ;;  %v1458_v49 = vsel %vm474_vm0, %v471_v48, 0 }
  0xeb   : > { %v1116_v59 = vadd.f32 %v1115_v57, %v1033_v58  ;;  %v1266_v60 = vpop.f32.mrf.mxu1  ;;  %v945_v61 = vadd.f32 %v3561_v55, %v3559_v51  ;;  %v950_v63 = vmul.f32 %v3561_v55, %v3561_v55  ;;  %v3606_v47 = vand.u32 4294901760, %v1529_v45 }
  0xec   : > { %v1190_v1 = vpop.f32.mrf.mxu0  ;;  %v3610_v50 = vand.u32 4294901760, %v1458_v49 }
  0xed   : > { %v1191_v2 = vadd.f32 %v1190_v1, %v1114_v56  ;;  %946 = vadd.xlane.f32.xlu0 %v945_v61  ;;  %v1268_v3 = vpop.f32.mrf.mxu1  ;;  %v951_v4 = vadd.f32 %v950_v63, %v949_v62  ;;  %3413 = vmatprep.mubr.f32.mxu0 %v3606_v47 }
  0xee   : > { %v1192_v5 = vpop.f32.mrf.mxu0  ;;  %v3613_v52 = vsub.f32 %v1458_v49, %v3610_v50 }
  0xef   : > { %v1267_v6 = vadd.f32 %v1266_v60, %v1191_v2  ;;  %v1193_v7 = vadd.f32 %v1192_v5, %v1116_v59  ;;  %952 = vadd.xlane.f32.xlu1 %v951_v4  ;;  %v1418_v8 = vpop.f32.mrf.mxu1 }
  0xf0   : > { %v1344_v9 = vpop.f32.mrf.mxu0  ;;  %v3616_v54 = vand.u32 4294901760, %v3613_v52 }
  0xf1   : > { %v1269_v10 = vadd.f32 %v1268_v3, %v1193_v7  ;;  %v1345_v11 = vadd.f32 %v1344_v9, %v1267_v6  ;;  %v1420_v13 = vpop.f32.mrf.mxu1 }
  0xf2   : > { %v1346_v12 = vpop.f32.mrf.mxu0  ;;  %v1539_v59 = vsub.f32 %v3613_v52, %v3616_v54 }
  0xf3   : > { %v3569_v14 = vadd.f32 %v1418_v8, %v1345_v11  ;;  %v1347_v15 = vadd.f32 %v1346_v12, %v1269_v10 }
  0xf4   : > { %v3622_v3 = vand.u32 4294901760, %v1539_v59 }
  0xf5   : > { %v3571_v16 = vadd.f32 %v1420_v13, %v1347_v15  ;;  %v1430_v18 = vmul.f32 %v3569_v14, %v3569_v14 }
  0xf7   : > { %v1426_v17 = vadd.f32 %v3571_v16, %v3569_v14  ;;  %v1431_v19 = vmul.f32 %v3571_v16, %v3571_v16 }
  0xf9   : > { %1427 = vadd.xlane.f32.xlu0 %v1426_v17  ;;  %v1432_v20 = vadd.f32 %v1431_v19, %v1430_v18 }
  0xfb   : > { %1433 = vadd.xlane.f32.xlu1 %v1432_v20 }
 0x176   : > { %v947_v22 = vpop.xlane.xlu0 %946 }
 0x178   : > { %v953_v23 = vpop.xlane.xlu1 %952 }
 0x182   : > { %v1428_v24 = vpop.xlane.xlu0 %1427 }
 0x183   : > { %v1429_v25 = vadd.f32 %v1428_v24, %v947_v22 }
 0x184   : > { %v1434_v26 = vpop.xlane.xlu1 %1433 }
 0x185   : > { %v1436_v27 = vmul.f32 0.0015432099, %v1429_v25  ;;  %v1435_v28 = vadd.f32 %v1434_v26, %v953_v23 }
 0x187   : > { %v1438_v29 = vmul.f32 %v1436_v27, %v1436_v27  ;;  %v1437_v30 = vmul.f32 0.0015432099, %v1435_v28 }
 0x189   : > { %v1439_v31 = vsub.f32 %v1437_v30, %v1438_v29 }
 0x18b   : > { %v1440_v32 = vmax.f32 %v1439_v31, 0.0 }
 0x18d   : > { %v1441_v33 = vadd.f32 1e-05, %v1440_v32 }
 0x18f   : > { %3453 = vrsqrt.f32 %v1441_v33 }
 0x19c   : > { %v3454_v38 = vpop.eup %3453 }
 0x19d   : > { %v1444_v39 = vmul.f32 %v3454_v38, %v1443_v35 }
 0x19f   : > { %1959 = vperm.xlu1 %3452, %v1444_v39   ;;  %v1446_v42 = vmul.f32 %v1444_v39, %v1436_v27 }
 0x1a1   : > { %v1447_v44 = vsub.f32 %v1445_v41, %v1446_v42 }
 0x1a3   : > { %1966 = vperm.xlu1 %3452, %v1447_v44   ;;  %v1448_v46 = vmax.f32 %v1447_v44, 0.0 }
 0x1a5   : > { %1451 = vperm.xlu0 %3451, %v1448_v46  }
 0x21a   : > { %v1960_v53 = vpop.permute.xlu1 %1959 }
 0x21b   : > { %v1962_v56 = vmul.f32 %v1960_v53, %v3559_v51  ;;  %v1963_v57 = vmul.f32 %v1960_v53, %v3561_v55  ;;  %v2514_v7 = vmul.f32 %v1960_v53, %v3571_v16  ;;  %v2513_v17 = vmul.f32 %v1960_v53, %v3569_v14 }
 0x21e   : > { %v1967_v58 = vpop.permute.xlu1 %1966 }
 0x21f   : > { %v1969_v60 = vadd.f32 %v1967_v58, %v1962_v56  ;;  %v1970_v61 = vadd.f32 %v1967_v58, %v1963_v57  ;;  %v2516_v10 = vadd.f32 %v2514_v7, %v1967_v58  ;;  %v2515_v18 = vadd.f32 %v2513_v17, %v1967_v58 }
 0x220   : > { %v1452_v62 = vpop.permute.xlu0 %1451 }
 0x221   : > { %v1971_v63 = vmax.f32 %v1969_v60, 0.0  ;;  %v1972_v1 = vmax.f32 %v1970_v61, 0.0  ;;  %v1491_v2 = vand.u32 4294901760, %v1452_v62  ;;  %v2518_v15 = vmax.f32 %v2516_v10, 0.0 }
 0x222   : > { %v2517_v14 = vmax.f32 %v2515_v18, 0.0 }
 0x223   : > { %v3624_v4 = vand.u32 4294901760, %v1972_v1  ;;  %v1578_v5 = vsub.f32 %v1452_v62, %v1491_v2  ;;  %3411 = vmatprep.subr.mxu0 %v1491_v2  ;;  %v3626_v51 = vand.u32 4294901760, %v1971_v63  ;;  %v3643_v21 = vand.u32 4294901760, %v2518_v15 }
 0x224   : > { %3412 = vmatpush3.msra.mxu0 %v1491_v2  ;;  %v2551_v24 = vand.u32 4294901760, %v2517_v14 }
 0x225   : > { %3414 = vmatmul.mubr.f32.vlgmr.msra.gmra.mxu0 %v3622_v3  ;;  %3421 = vmatprep.subr.mxu0 %v1578_v5  ;;  %v1579_v55 = vand.u32 4294901760, %v1578_v5  ;;  %v2093_v6 = vsub.f32 %v1972_v1, %v3624_v4  ;;  %v2099_v9 = vsub.f32 %v1971_v63, %v3626_v51  ;;  %v2639_v23 = vsub.f32 %v2518_v15, %v3643_v21 }
 0x226   : > { %3422 = vmatpush3.msra.mxu0 %v1578_v5  ;;  %3423 = vmatprep.mubr.f32.mxu0 %v3598_v40  ;;  %v2645_v26 = vsub.f32 %v2517_v14, %v2551_v24 }
 0x227   : > { %3431 = vmatprep.subr.mxu0 %v1579_v55  ;;  %v1580_v8 = vsub.f32 %v1578_v5, %v1579_v55  ;;  %v2094_v12 = vand.u32 4294901760, %v2093_v6  ;;  %v2100_v13 = vand.u32 4294901760, %v2099_v9  ;;  %v2640_v25 = vand.u32 4294901760, %v2639_v23 }
 0x228   : > { %v2646_v28 = vand.u32 4294901760, %v2645_v26 }
 0x229   : > { %3424 = vmatmul.mubr.f32.vlgmr.msra.gmra.mxu0 %v3613_v52  ;;  %v1581_v11 = vand.u32 4294901760, %v1580_v8  ;;  %v2095_v16 = vsub.f32 %v2093_v6, %v2094_v12  ;;  %v2101_v19 = vsub.f32 %v2099_v9, %v2100_v13  ;;  %v2641_v27 = vsub.f32 %v2639_v23, %v2640_v25 }
 0x22a   : > { %3432 = vmatpush3.msra.mxu0 %v1579_v55  ;;  %3433 = vmatprep.mubr.f32.mxu0 %v3595_v37  ;;  %v2647_v30 = vsub.f32 %v2645_v26, %v2646_v28 }
 0x22b   : > { %2004 = vmatprep.subr.mxu0 %v3624_v4  ;;  %3416 = vmatprep.subr.mxu1 %v1581_v11  ;;  %v2096_v20 = vand.u32 4294901760, %v2095_v16  ;;  %v2102_v22 = vand.u32 4294901760, %v2101_v19  ;;  %v2642_v29 = vand.u32 4294901760, %v2641_v27 }
 0x22c   : > { %3417 = vmatpush3.msra.mxu1 %v1581_v11  ;;  %v2648_v31 = vand.u32 4294901760, %v2647_v30 }
 0x22d   : > { %3419 = vmatmul.mubr.f32.vlgmr.msra.gmra.mxu1 %v3610_v50  ;;  %3426 = vmatprep.subr.mxu1 %v1491_v2 }
 0x22e   : > { %3434 = vmatmul.mubr.f32.vlgmr.msra.gmra.mxu0 %v3610_v50  ;;  %3427 = vmatpush3.msra.mxu1 %v1491_v2 }
 0x22f   : > { %2006 = vmatpush1.msra.mxu0 %v3626_v51  ;;  %3436 = vmatprep.subr.mxu1 %v1491_v2 }
 0x230   : > { %2183 = vmatprep.subr.mxu0 %v2093_v6  ;;  %3428 = vmatprep.mubr.f32.mxu1 %v3602_v43 }
 0x231   : > { %2039 = vmatprep.mubr.f32.mxu0 %v3467_v0  ;;  %3429 = vmatmul.mubr.f32.vlgmr.msra.gmra.mxu1 %v3616_v54 }
 0x232   : > { %3437 = vmatpush3.msra.mxu1 %v1491_v2  ;;  %2045 = vmatmul.mubr.f32.vlgmr.msra.gmra.mxu0 %v3606_v47 }
 0x233   : > { %2186 = vmatpush1.msra.mxu0 %v2099_v9  ;;  %2097 = vmatprep.subr.mxu1 %v2096_v20 }
 0x234   : > { %2354 = vmatprep.subr.mxu0 %v2094_v12  ;;  %3438 = vmatprep.mubr.f32.mxu1 %v3595_v37 }
 0x235   : > { %2050 = vmatprep.mubr.f32.mxu0 %v3467_v0  ;;  %3439 = vmatmul.mubr.f32.vlgmr.msra.gmra.mxu1 %v3610_v50 }
 0x236   : > { %2056 = vmatmul.mubr.f32.gmra.mxu0 %v3622_v3  ;;  %2103 = vmatpush1.msra.mxu1 %v2102_v22 }
 0x237   : > { %2267 = vmatprep.subr.mxu1 %v3624_v4  ;;  %2136 = vmatprep.mubr.f32.mxu1 %v3467_v0 }
 0x238   : > { %2219 = vmatprep.mubr.f32.mxu0 %v3467_v0 }
 0x239   : > { %2138 = vmatmul.mubr.f32.vlgmr.msra.gmra.mxu1 %v3595_v37 }
 0x23a   : > { %2222 = vmatmul.mubr.f32.vlgmr.msra.gmra.mxu0 %v3598_v40  ;;  %2269 = vmatpush1.msra.mxu1 %v3626_v51 }
 0x23b   : > { %2358 = vmatpush1.msra.mxu0 %v2100_v13  ;;  %2437 = vmatprep.subr.mxu1 %v3624_v4 }
 0x23c   : > { %2550 = vmatprep.subr.mxu0 %v3643_v21  ;;  %2143 = vmatprep.mubr.f32.mxu1 %v3467_v0 }
 0x23d   : > { %2227 = vmatprep.mubr.f32.mxu0 %v3467_v0  ;;  %2145 = vmatmul.mubr.f32.gmra.mxu1 %v3610_v50 }
 0x23e   : > { %2230 = vmatmul.mubr.f32.gmra.mxu0 %v3613_v52  ;;  %2302 = vmatprep.mubr.f32.mxu1 %v3467_v0 }
 0x23f   : > { %2391 = vmatprep.mubr.f32.mxu0 %v3467_v0 }
 0x241   : > { %2306 = vmatmul.mubr.f32.vlgmr.msra.gmra.mxu1 %v3602_v43 }
 0x242   : > { %2393 = vmatmul.mubr.f32.vlgmr.msra.gmra.mxu0 %v3595_v37  ;;  %2439 = vmatpush1.msra.mxu1 %v3626_v51 }
 0x243   : > { %2552 = vmatpush1.msra.mxu0 %v2551_v24  ;;  %2643 = vmatprep.subr.mxu1 %v2642_v29 }
 0x244   : > { %2729 = vmatprep.subr.mxu0 %v2639_v23  ;;  %2311 = vmatprep.mubr.f32.mxu1 %v3467_v0 }
 0x245   : > { %2398 = vmatprep.mubr.f32.mxu0 %v3467_v0  ;;  %2315 = vmatmul.mubr.f32.gmra.mxu1 %v3616_v54 }
 0x246   : > { %2400 = vmatmul.mubr.f32.gmra.mxu0 %v3610_v50  ;;  %2472 = vmatprep.mubr.f32.mxu1 %v3467_v0 }
 0x247   : > { %2585 = vmatprep.mubr.f32.mxu0 %v3467_v0 }
 0x249   : > { %2474 = vmatmul.mubr.f32.vlgmr.msra.gmra.mxu1 %v3595_v37 }
 0x24a   : > { %2591 = vmatmul.mubr.f32.vlgmr.msra.gmra.mxu0 %v3606_v47  ;;  %2649 = vmatpush1.msra.mxu1 %v2648_v31 }
 0x24b   : > { %2732 = vmatpush1.msra.mxu0 %v2645_v26  ;;  %2813 = vmatprep.subr.mxu1 %v3643_v21 }
 0x24c   : > { %2900 = vmatprep.subr.mxu0 %v2640_v25  ;;  %2479 = vmatprep.mubr.f32.mxu1 %v3467_v0 }
 0x24d   : > { %2596 = vmatprep.mubr.f32.mxu0 %v3467_v0  ;;  %2481 = vmatmul.mubr.f32.gmra.mxu1 %v3610_v50 }
 0x24e   : > { %2602 = vmatmul.mubr.f32.gmra.mxu0 %v3622_v3  ;;  %2682 = vmatprep.mubr.f32.mxu1 %v3467_v0 }
 0x24f   : > { %2765 = vmatprep.mubr.f32.mxu0 %v3467_v0 }
 0x251   : > { %2684 = vmatmul.mubr.f32.vlgmr.msra.gmra.mxu1 %v3595_v37 }
 0x252   : > { %2768 = vmatmul.mubr.f32.vlgmr.msra.gmra.mxu0 %v3598_v40  ;;  %2815 = vmatpush1.msra.mxu1 %v2551_v24 }
 0x253   : > { %2904 = vmatpush1.msra.mxu0 %v2646_v28  ;;  %2983 = vmatprep.subr.mxu1 %v3643_v21 }
 0x254   : > { %2689 = vmatprep.mubr.f32.mxu1 %v3467_v0  ;;  %2773 = vmatprep.mubr.f32.mxu0 %v3467_v0 }
 0x255   : > { %2691 = vmatmul.mubr.f32.gmra.mxu1 %v3610_v50 }
 0x256   : > { %2776 = vmatmul.mubr.f32.gmra.mxu0 %v3613_v52  ;;  %2848 = vmatprep.mubr.f32.mxu1 %v3467_v0 }
 0x257   : > { %2937 = vmatprep.mubr.f32.mxu0 %v3467_v0 }
 0x259   : > { %2852 = vmatmul.mubr.f32.vlgmr.msra.gmra.mxu1 %v3602_v43 }
 0x25a   : > { %2985 = vmatpush1.msra.mxu1 %v2551_v24  ;;  %2939 = vmatmul.mubr.f32.vlgmr.msra.gmra.mxu0 %v3595_v37 }
 0x25b   : > { %2857 = vmatprep.mubr.f32.mxu1 %v3467_v0  ;;  %2944 = vmatprep.mubr.f32.mxu0 %v3467_v0 }
 0x25d   : > { %2861 = vmatmul.mubr.f32.gmra.mxu1 %v3616_v54 }
 0x25e   : > { %2946 = vmatmul.mubr.f32.gmra.mxu0 %v3610_v50  ;;  %3018 = vmatprep.mubr.f32.mxu1 %v3467_v0 }
 0x261   : > { %3020 = vmatmul.mubr.f32.vlgmr.msra.gmra.mxu1 %v3595_v37 }
 0x262   : > { %3025 = vmatprep.mubr.f32.mxu1 %v3467_v0 }
 0x265   : > { %3027 = vmatmul.mubr.f32.gmra.mxu1 %v3610_v50 }
 0x2e5   : > { %v3415_v32 = vpop.f32.mrf.mxu0 }
 0x2e7   : > { %v1532_v33 = vpop.f32.mrf.mxu0 }
 0x2e9   : > { %v3425_v34 = vpop.f32.mrf.mxu0 }
 0x2eb   : > { %v1698_v35 = vpop.f32.mrf.mxu0 }
 0x2ed   : > { %v3420_v36 = vpop.f32.mrf.mxu1 }
 0x2ee   : > { %v1625_v38 = vadd.f32 %v3420_v36, %v3415_v32  ;;  %v3435_v39 = vpop.f32.mrf.mxu0 }
 0x2ef   : > { %v1618_v40 = vpop.f32.mrf.mxu1 }
 0x2f0   : > { %v1619_v41 = vadd.f32 %v1618_v40, %v1532_v33  ;;  %v1706_v42 = vadd.f32 %v3425_v34, %v1625_v38  ;;  %v1861_v43 = vpop.f32.mrf.mxu0 }
 0x2f1   : > { %v3430_v44 = vpop.f32.mrf.mxu1 }
 0x2f2   : > { %v1788_v45 = vadd.f32 %v3430_v44, %v1706_v42  ;;  %v1699_v46 = vadd.f32 %v1698_v35, %v1619_v41  ;;  %v2046_v47 = vpop.f32.mrf.mxu0 }
 0x2f3   : > { %v1779_v37 = vpop.f32.mrf.mxu1 }
 0x2f4   : > { %v1780_v48 = vadd.f32 %v1779_v37, %v1699_v46  ;;  %v1868_v0 = vadd.f32 %v3435_v39, %v1788_v45  ;;  %v2048_v49 = vpop.f32.mrf.mxu0 }
 0x2f5   : > { %v3440_v50 = vpop.f32.mrf.mxu1 }
 0x2f6   : > { %v3702_v52 = vadd.f32 %v3440_v50, %v1868_v0  ;;  %v1862_v53 = vadd.f32 %v1861_v43, %v1780_v48  ;;  %v2057_v54 = vpop.f32.mrf.mxu0 }
 0x2f7   : > { %v1939_v56 = vpop.f32.mrf.mxu1 }
 0x2f8   : > { %v3704_v57 = vadd.f32 %v1939_v56, %v1862_v53  ;;  %v2059_v58 = vpop.f32.mrf.mxu0 }
 0x2f9   : > { %v2139_v59 = vpop.f32.mrf.mxu1 }
 0x2fa   : > { %v2223_v60 = vpop.f32.mrf.mxu0  ;;  %v2140_v3 = vadd.f32 %v2139_v59, %v2046_v47 }
 0x2fb   : > { %v2141_v61 = vpop.f32.mrf.mxu1 }
 0x2fc   : > { %v2225_v62 = vpop.f32.mrf.mxu0  ;;  %v2142_v4 = vadd.f32 %v2141_v61, %v2048_v49  ;;  %v2224_v7 = vadd.f32 %v2223_v60, %v2140_v3 }
 0x2fd   : > { %v2146_v63 = vpop.f32.mrf.mxu1 }
 0x2fe   : > { %v2231_v1 = vpop.f32.mrf.mxu0  ;;  %v2147_v8 = vadd.f32 %v2146_v63, %v2057_v54  ;;  %v2226_v9 = vadd.f32 %v2225_v62, %v2142_v4 }
 0x2ff   : > { %v2148_v2 = vpop.f32.mrf.mxu1 }
 0x300   : > { %v2233_v5 = vpop.f32.mrf.mxu0  ;;  %v2149_v10 = vadd.f32 %v2148_v2, %v2059_v58  ;;  %v2232_v18 = vadd.f32 %v2231_v1, %v2147_v8 }
 0x301   : > { %v2307_v51 = vpop.f32.mrf.mxu1 }
 0x302   : > { %v2394_v55 = vpop.f32.mrf.mxu0  ;;  %v2308_v13 = vadd.f32 %v2307_v51, %v2224_v7  ;;  %v2234_v19 = vadd.f32 %v2233_v5, %v2149_v10 }
 0x303   : > { %v2309_v6 = vpop.f32.mrf.mxu1 }
 0x304   : > { %v2396_v11 = vpop.f32.mrf.mxu0  ;;  %v2310_v15 = vadd.f32 %v2309_v6, %v2226_v9  ;;  %v2395_v14 = vadd.f32 %v2394_v55, %v2308_v13 }
 0x305   : > { %v2316_v12 = vpop.f32.mrf.mxu1 }
 0x306   : > { %v2401_v16 = vpop.f32.mrf.mxu0  ;;  %v2317_v22 = vadd.f32 %v2316_v12, %v2232_v18  ;;  %v2397_v23 = vadd.f32 %v2396_v11, %v2310_v15 }
 0x307   : > { %v2318_v17 = vpop.f32.mrf.mxu1 }
 0x308   : > { %v2403_v20 = vpop.f32.mrf.mxu0  ;;  %v2319_v24 = vadd.f32 %v2318_v17, %v2234_v19  ;;  %v2402_v31 = vadd.f32 %v2401_v16, %v2317_v22 }
 0x309   : > { %v2475_v21 = vpop.f32.mrf.mxu1 }
 0x30a   : > { %v2592_v25 = vpop.f32.mrf.mxu0  ;;  %v3706_v27 = vadd.f32 %v2475_v21, %v2395_v14  ;;  %v2404_v32 = vadd.f32 %v2403_v20, %v2319_v24 }
 0x30b   : > { %v2477_v26 = vpop.f32.mrf.mxu1 }
 0x30c   : > { %v3708_v28 = vadd.f32 %v2477_v26, %v2397_v23  ;;  %v2594_v29 = vpop.f32.mrf.mxu0  ;;  %v2499_v41 = vmul.f32 %v3706_v27, %v3706_v27 }
 0x30d   : > { %v2482_v30 = vpop.f32.mrf.mxu1 }
 0x30e   : > { %v2603_v33 = vpop.f32.mrf.mxu0  ;;  %v2491_v34 = vadd.f32 %v3708_v28, %v3706_v27  ;;  %v2500_v35 = vmul.f32 %v3708_v28, %v3708_v28  ;;  %v3714_v38 = vadd.f32 %v2482_v30, %v2402_v31 }
 0x30f   : > { %v2484_v36 = vpop.f32.mrf.mxu1 }
 0x310   : > { %v3716_v39 = vadd.f32 %v2484_v36, %v2404_v32  ;;  %2492 = vadd.xlane.f32.xlu1 %v2491_v34  ;;  %v2605_v40 = vpop.f32.mrf.mxu0  ;;  %v2503_v44 = vadd.f32 %v2500_v35, %v2499_v41  ;;  %v2501_v48 = vmul.f32 %v3714_v38, %v3714_v38  ;;  %v1952_v41 = vmul.f32 %v3702_v52, %v3702_v52 }
 0x311   : > { %v2685_v42 = vpop.f32.mrf.mxu1 }
 0x312   : > { %v2769_v43 = vpop.f32.mrf.mxu0  ;;  %v2494_v45 = vadd.f32 %v3716_v39, %v3714_v38  ;;  %v2502_v46 = vmul.f32 %v3716_v39, %v3716_v39  ;;  %v2686_v54 = vadd.f32 %v2685_v42, %v2592_v25 }
 0x313   : > { %v2687_v47 = vpop.f32.mrf.mxu1 }
 0x314   : > { %2504 = vadd.xlane.f32.xlu1 %v2503_v44  ;;  %2495 = vadd.xlane.f32.xlu0 %v2494_v45  ;;  %v2771_v37 = vpop.f32.mrf.mxu0  ;;  %v2506_v50 = vadd.f32 %v2502_v46, %v2501_v48  ;;  %v2688_v56 = vadd.f32 %v2687_v47, %v2594_v29  ;;  %v2770_v63 = vadd.f32 %v2769_v43, %v2686_v54  ;;  %v1950_v46 = vmul.f32 136.0, %v3702_v52 }
 0x315   : > { %v2692_v0 = vpop.f32.mrf.mxu1  ;;  %v1951_v45 = vmul.f32 %v3704_v57, %v3704_v57 }
 0x316   : > { %v2777_v49 = vpop.f32.mrf.mxu0  ;;  %v2693_v60 = vadd.f32 %v2692_v0, %v2603_v33  ;;  %v2772_v1 = vadd.f32 %v2771_v37, %v2688_v56  ;;  %v1954_v37 = vmul.f32 136.0, %v1952_v41 }
 0x317   : > { %v2694_v53 = vpop.f32.mrf.mxu1 }
 0x318   : > { %2507 = vadd.xlane.f32.xlu1 %v2506_v50  ;;  %v2779_v58 = vpop.f32.mrf.mxu0  ;;  %v2695_v2 = vadd.f32 %v2694_v53, %v2605_v40  ;;  %v2778_v5 = vadd.f32 %v2777_v49, %v2693_v60  ;;  %v1949_v40 = vmul.f32 136.0, %v3704_v57  ;;  %v1953_v49 = vmul.f32 136.0, %v1951_v45 }
 0x319   : > { %v2853_v59 = vpop.f32.mrf.mxu1 }
 0x31a   : > { %v2940_v61 = vpop.f32.mrf.mxu0  ;;  %v2854_v51 = vadd.f32 %v2853_v59, %v2770_v63  ;;  %v2780_v8 = vadd.f32 %v2779_v58, %v2695_v2 }
 0x31b   : > { %v2855_v62 = vpop.f32.mrf.mxu1 }
 0x31c   : > { %v2942_v3 = vpop.f32.mrf.mxu0  ;;  %v2856_v55 = vadd.f32 %v2855_v62, %v2772_v1  ;;  %v2941_v11 = vadd.f32 %v2940_v61, %v2854_v51 }
 0x31d   : > { %v2862_v4 = vpop.f32.mrf.mxu1 }
 0x31e   : > { %v2947_v7 = vpop.f32.mrf.mxu0  ;;  %v2863_v9 = vadd.f32 %v2862_v4, %v2778_v5  ;;  %v2943_v12 = vadd.f32 %v2942_v3, %v2856_v55 }
 0x31f   : > { %v2864_v6 = vpop.f32.mrf.mxu1 }
 0x320   : > { %v2865_v13 = vadd.f32 %v2864_v6, %v2780_v8  ;;  %v2949_v15 = vpop.f32.mrf.mxu0  ;;  %v2948_v17 = vadd.f32 %v2947_v7, %v2863_v9  ;;  %v3073_v8 = vld [vmem:[%s448_s12 + $0x8] sm:$0xff] }
 0x321   : > { %v3021_v10 = vpop.f32.mrf.mxu1 }
 0x322   : > { %v3726_v18 = vadd.f32 %v3021_v10, %v2941_v11  ;;  %v2950_v21 = vadd.f32 %v2949_v15, %v2865_v13  ;;  %v3072_v10 = vld [vmem:[%s448_s12] sm:$0xff]  ;;  %v3077_v13 = vld [vmem:[%s453_s15 + $0x8] sm:$0xff] }
 0x323   : > { %v3023_v16 = vpop.f32.mrf.mxu1 }
 0x324   : > { %v3728_v19 = vadd.f32 %v3023_v16, %v2943_v12  ;;  %v3046_v32 = vmul.f32 %v3726_v18, %v3726_v18 }
 0x325   : > { %v3028_v20 = vpop.f32.mrf.mxu1 }
 0x326   : > { %v3730_v14 = vadd.f32 %v3028_v20, %v2948_v17  ;;  %v3038_v22 = vadd.f32 %v3728_v19, %v3726_v18  ;;  %v3047_v30 = vmul.f32 %v3728_v19, %v3728_v19  ;;  %v3076_v17 = vld [vmem:[%s453_s15] sm:$0xff] }
 0x327   : > { %v3030_v23 = vpop.f32.mrf.mxu1 }
 0x328   : > { %v3734_v24 = vadd.f32 %v3030_v23, %v2950_v21  ;;  %3039 = vadd.xlane.f32.xlu1 %v3038_v22  ;;  %v3048_v26 = vmul.f32 %v3730_v14, %v3730_v14  ;;  %v3050_v33 = vadd.f32 %v3047_v30, %v3046_v32 }
 0x32a   : > { %v3041_v25 = vadd.f32 %v3734_v24, %v3730_v14  ;;  %v3049_v29 = vmul.f32 %v3734_v24, %v3734_v24 }
 0x32c   : > { %3042 = vadd.xlane.f32.xlu1 %v3041_v25  ;;  %v3053_v31 = vadd.f32 %v3049_v29, %v3048_v26 }
 0x32e   : > { %3054 = vadd.xlane.f32.xlu0 %v3053_v31 }
 0x330   : > { %3051 = vadd.xlane.f32.xlu1 %v3050_v33 }
 0x399   : > { %v2493_v34 = vpop.xlane.xlu1 %2492 }
 0x39a   : > { %v2497_v44 = vadd.f32 %v2493_v34, %v1949_v40 }
 0x39d   : > { %v2505_v35 = vpop.xlane.xlu1 %2504  ;;  %v2496_v42 = vpop.xlane.xlu0 %2495 }
 0x39e   : > { %v2498_v47 = vadd.f32 %v2496_v42, %v1950_v46  ;;  %v2509_v56 = vadd.f32 %v2505_v35, %v1953_v49 }
 0x3a1   : > { %v2508_v36 = vpop.xlane.xlu1 %2507 }
 0x3a2   : > { %v2510_v50 = vadd.f32 %v2508_v36, %v1954_v37 }
 0x3b1   : > { %v3040_v43 = vpop.xlane.xlu1 %3039 }
 0x3b2   : > { %v3044_v48 = vadd.f32 %v3040_v43, %v2497_v44 }
 0x3b4   : > { %v3058_v58 = vmul.f32 0.00125, %v3044_v48 }
 0x3b5   : > { %v3043_v0 = vpop.xlane.xlu1 %3042 }
 0x3b6   : > { %v3045_v53 = vadd.f32 %v3043_v0, %v2498_v47  ;;  %v3062_v2 = vmul.f32 %v3058_v58, %v3058_v58 }
 0x3b7   : > { %v3055_v54 = vpop.xlane.xlu0 %3054 }
 0x3b8   : > { %v3059_v59 = vmul.f32 0.00125, %v3045_v53  ;;  %v3057_v60 = vadd.f32 %v3055_v54, %v2510_v50 }
 0x3b9   : > { %v3052_v61 = vpop.xlane.xlu1 %3051 }
 0x3ba   : > { %v3063_v62 = vmul.f32 %v3059_v59, %v3059_v59  ;;  %v3061_v63 = vmul.f32 0.00125, %v3057_v60  ;;  %v3056_v1 = vadd.f32 %v3052_v61, %v2509_v56 }
 0x3bc   : > { %v3065_v3 = vsub.f32 %v3061_v63, %v3063_v62  ;;  %v3060_v4 = vmul.f32 0.00125, %v3056_v1 }
 0x3be   : > { %v3067_v5 = vmax.f32 %v3065_v3, 0.0  ;;  %v3064_v51 = vsub.f32 %v3060_v4, %v3062_v2 }
 0x3c0   : > { %v3069_v55 = vadd.f32 1e-05, %v3067_v5  ;;  %v3066_v6 = vmax.f32 %v3064_v51, 0.0 }
 0x3c2   : > { %3455 = vrsqrt.f32 %v3069_v55  ;;  %v3068_v7 = vadd.f32 1e-05, %v3066_v6 }
 0x3c4   : > { %3457 = vrsqrt.f32 %v3068_v7 }
 0x3cf   : > { %v3456_v9 = vpop.eup %3455 }
 0x3d0   : > { %v3075_v11 = vmul.f32 %v3456_v9, %v3073_v8 }
 0x3d1   : > { %v3458_v12 = vpop.eup %3457 }
 0x3d2   : > { %3093 = vperm.xlu0 %3451, %v3075_v11   ;;  %v3074_v15 = vmul.f32 %v3458_v12, %v3072_v10  ;;  %v3079_v16 = vmul.f32 %v3075_v11, %v3059_v59  ;;  %v3143_v20 = vmul.f32 %v3075_v11, %v3702_v52 }
 0x3d4   : > { %3088 = vperm.xlu1 %3452, %v3074_v15   ;;  %v3078_v21 = vmul.f32 %v3074_v15, %v3058_v58  ;;  %v3081_v22 = vsub.f32 %v3077_v13, %v3079_v16  ;;  %v3142_v23 = vmul.f32 %v3074_v15, %v3704_v57 }
 0x3d6   : > { %v3080_v25 = vsub.f32 %v3076_v17, %v3078_v21  ;;  %v3145_v26 = vadd.f32 %v3143_v20, %v3081_v22  ;;  %v3152_v29 = vmax.f32 %v3081_v22, 0.0 }
 0x3d8   : > { %3102 = vperm.xlu1 %3452, %v3080_v25   ;;  %v3144_v52 = vadd.f32 %v3142_v23, %v3080_v25  ;;  %v3151_v30 = vmax.f32 %v3080_v25, 0.0  ;;  %v3147_v31 = vmax.f32 %v3145_v26, 0.0  ;;  %3154 = vst.msk [vmem:[%s468_s18 + $0x8] sm:$0xff] %vm3148_vm1, %v3152_v29 }
 0x3da   : > { %v3146_v32 = vmax.f32 %v3144_v52, 0.0  ;;  %3153 = vst.msk [vmem:[%s468_s18] sm:$0xff] %vm3148_vm1, %v3151_v30  ;;  %3150 = vst.msk [vmem:[%s463_s22 + $0x8] sm:$0xff] %vm3148_vm1, %v3147_v31 }
 0x3dc   : > { %3149 = vst.msk [vmem:[%s463_s22] sm:$0xff] %vm3148_vm1, %v3146_v32  ;;  %3107 = vperm.xlu1 %3452, %v3081_v22  }
 0x44d   : > { %v3094_v57 = vpop.permute.xlu0 %3093 }
 0x44e   : > { %v3098_v46 = vmul.f32 %v3094_v57, %v3714_v38  ;;  %v3099_v47 = vmul.f32 %v3094_v57, %v3716_v39 }
 0x44f   : > { %v3089_v33 = vpop.permute.xlu1 %3088 }
 0x450   : > { %v3096_v34 = vmul.f32 %v3089_v33, %v3706_v27  ;;  %v3097_v35 = vmul.f32 %v3089_v33, %v3708_v28  ;;  %v3126_v36 = vmul.f32 %v3089_v33, %v3726_v18  ;;  %v3127_v40 = vmul.f32 %v3089_v33, %v3728_v19 }
 0x451   : > { %v3128_v27 = vmul.f32 %v3094_v57, %v3730_v14  ;;  %v3129_v28 = vmul.f32 %v3094_v57, %v3734_v24 }
 0x453   : > { %v3103_v41 = vpop.permute.xlu1 %3102 }
 0x454   : > { %v3110_v42 = vadd.f32 %v3103_v41, %v3096_v34  ;;  %v3111_v43 = vadd.f32 %v3103_v41, %v3097_v35  ;;  %v3130_v44 = vadd.f32 %v3126_v36, %v3103_v41  ;;  %v3131_v45 = vadd.f32 %v3127_v40, %v3103_v41 }
 0x456   : > { %v3114_v18 = vmax.f32 %v3110_v42, 0.0  ;;  %v3115_v37 = vmax.f32 %v3111_v43, 0.0  ;;  %v3134_v19 = vmax.f32 %v3130_v44, 0.0  ;;  %v3135_v48 = vmax.f32 %v3131_v45, 0.0 }
 0x457   : > { %v3108_v0 = vpop.permute.xlu1 %3107 }
 0x458   : > { %3118 = vst [vmem:[%s458_s25] sm:$0xff] %v3114_v18  ;;  %3119 = vst [vmem:[%s458_s25 + $0x8] sm:$0xff] %v3115_v37  ;;  %v3112_v49 = vadd.f32 %v3108_v0, %v3098_v46  ;;  %v3113_v50 = vadd.f32 %v3108_v0, %v3099_v47  ;;  %v3132_v53 = vadd.f32 %v3128_v27, %v3108_v0 }
 0x459   : > { %3380 = vst [vmem:[%s458_s25 + $0x20] sm:$0xff] %v3134_v19  ;;  %3381 = vst [vmem:[%s458_s25 + $0x28] sm:$0xff] %v3135_v48  ;;  %v3133_v54 = vadd.f32 %v3129_v28, %v3108_v0 }
 0x45a   : > { %v3116_v38 = vmax.f32 %v3112_v49, 0.0  ;;  %v3117_v56 = vmax.f32 %v3113_v50, 0.0  ;;  %v3136_v39 = vmax.f32 %v3132_v53, 0.0 }
 0x45b   : > { %v3137_v58 = vmax.f32 %v3133_v54, 0.0 }
 0x45c   : > { %3120 = vst [vmem:[%s458_s25 + $0x10] sm:$0xff] %v3116_v38  ;;  %3121 = vst [vmem:[%s458_s25 + $0x18] sm:$0xff] %v3117_v56 }
 0x45d   : > { %3382 = vst [vmem:[%s458_s25 + $0x30] sm:$0xff] %v3136_v39  ;;  %3383 = vst [vmem:[%s458_s25 + $0x38] sm:$0xff] %v3137_v58 }
 0x45e PF: > { %s20_s30 = sadd.s32 1, %s3465_s30  }
 0x45f   : > { %p17_p4 = scmp.ge.s32.totalorder %s20_s30, 5  }
 0x461   :  { %19 = sbr.rel (!%p17_p4) target bundleno = 1 (0x1), region = 123 }

</bundles_post_ra>
